<compile_context>
chip_gen: v7x
topology: tpu7x:2x2x1
jax: 0.10.0
libtpu: 0.0.40
codegen_flags: <defaults>
</compile_context>

<pallas_src>
import functools

import jax
import jax.numpy as jnp
from jax.experimental import pallas as pl
from jax.experimental.pallas import tpu as pltpu

LN_EPS = 1e-5  # torch.nn.LayerNorm default eps


def _layernorm(x, g, b):
    mu = jnp.mean(x, axis=-1, keepdims=True)
    var = jnp.mean((x - mu) ** 2, axis=-1, keepdims=True)
    return (x - mu) * jax.lax.rsqrt(var + LN_EPS) * g + b


def _block_kernel(x_ref,
                  wq_ref, bq_ref, wk_ref, bk_ref, wv_ref, bv_ref,
                  wo_ref, bo_ref,
                  g1_ref, b1_ref, g2_ref, b2_ref,
                  w1_ref, c1_ref, w2_ref, c2_ref,
                  o_ref, *, B, S, D, H):
    Hd = D // H
    N = B * S

    x = x_ref[...].reshape(N, D)                 # (B*S, D) f32; leading-dim merge only

    # ---------------- attention branch (pre-LN) ----------------
    h1 = _layernorm(x, g1_ref[...], b1_ref[...])
    hb = h1.astype(jnp.bfloat16)                 # bf16 operand for the MXU matmuls

    # Per-head projections.  Heads were split on the weights' leading dim in the
    # wrapper, so these are plain 2-D MXU matmuls: no activation lane slicing,
    # no lane concatenate.  (Loop is static and tiny: H=4.)
    q_parts, k_parts, v_parts = [], [], []
    for i in range(H):
        q_parts.append((jnp.dot(hb, wq_ref[i], preferred_element_type=jnp.float32)
                        + bq_ref[i]).reshape(B, S, Hd))
        k_parts.append((jnp.dot(hb, wk_ref[i], preferred_element_type=jnp.float32)
                        + bk_ref[i]).reshape(B, S, Hd))
        v_parts.append((jnp.dot(hb, wv_ref[i], preferred_element_type=jnp.float32)
                        + bv_ref[i]).reshape(B, S, Hd))
    q = jnp.concatenate(q_parts, axis=0)         # (H*B, S, Hd)
    k = jnp.concatenate(k_parts, axis=0)
    v = jnp.concatenate(v_parts, axis=0)

    # Causal additive bias, built once and broadcast over every (head, batch).
    row = jax.lax.broadcasted_iota(jnp.int32, (S, S), 0)
    col = jax.lax.broadcasted_iota(jnp.int32, (S, S), 1)
    neg = float(jnp.finfo(jnp.float32).min)
    bias = jnp.where(col > row, neg, 0.0).astype(jnp.float32)[None, :, :]

    # Scores for all B*H heads in one batched contraction (scale folded into wq).
    s = jnp.einsum('nqd,nkd->nqk', q, k,
                   preferred_element_type=jnp.float32) + bias        # (H*B, S, S)
    m = jnp.max(s, axis=-1, keepdims=True)
    e = jnp.exp(s - m)
    l = jnp.sum(e, axis=-1, keepdims=True)
    p = e * pl.reciprocal(l, approx=True)        # softmax via EUP reciprocal
    ctx = jnp.einsum('nqk,nkd->nqd', p, v,
                     preferred_element_type=jnp.float32)             # (H*B, S, Hd)
    ctx = ctx.reshape(H, B, S, Hd)

    # Output projection accumulated per head (wo pre-split to (H, Hd, D)).
    attn = None
    for i in range(H):
        part = jnp.dot(ctx[i].reshape(N, Hd).astype(jnp.bfloat16), wo_ref[i],
                       preferred_element_type=jnp.float32)           # (N, D)
        attn = part if attn is None else attn + part
    attn = attn + bo_ref[...]

    x1 = x + attn                                # residual 1

    # ---------------- MLP branch (pre-LN, quick GELU) ----------------
    h2 = _layernorm(x1, g2_ref[...], b2_ref[...])
    f = jnp.dot(h2.astype(jnp.bfloat16), w1_ref[...],
                preferred_element_type=jnp.float32) + c1_ref[...]    # (N, 4D)
    f = f * jax.nn.sigmoid(1.702 * f)            # x * sigmoid(1.702 * x)
    f = jnp.dot(f.astype(jnp.bfloat16), w2_ref[...],
                preferred_element_type=jnp.float32) + c2_ref[...]    # (N, D)

    out = x1 + f                                 # residual 2
    o_ref[...] = out.reshape(B, S, D).astype(o_ref.dtype)


def residual_attention_block(x, params):
    """x: (B, S, D) float32 -> (B, S, D) float32."""
    B, S, D = x.shape
    H = params["n_head"]
    operands = (x,
                params["wq"], params["bq"], params["wk"], params["bk"],
                params["wv"], params["bv"], params["wo"], params["bo"],
                params["g1"], params["b1"], params["g2"], params["b2"],
                params["w1"], params["c1"], params["w2"], params["c2"])
    vmem = pl.BlockSpec(memory_space=pltpu.MemorySpace.VMEM)
    kernel = functools.partial(_block_kernel, B=B, S=S, D=D, H=H)
    # TODO(synk): for production shapes, present lane-dense (.., 128) I/O slabs
    # and add a parallel grid axis (batch/heads) so v7x's second TensorCore is
    # used; at this toy size a single grid step is pure launch-overhead anyway.
    return pl.pallas_call(
        kernel,
        out_shape=jax.ShapeDtypeStruct((B, S, D), x.dtype),
        in_specs=[vmem] * len(operands),
        out_specs=vmem,
    )(*operands)


# ---- parameters (deterministic synthetic init) -------------------------------
def init_params(key, n_embd=32, n_head=4):
    D, H = n_embd, n_head
    Hd = D // H
    F = 4 * D
    ks = jax.random.split(key, 12)

    def nrm(k, shape):
        return 0.02 * jax.random.normal(k, shape, jnp.float32)

    # nn.Linear weights stored pre-transposed as (in, out): y = x @ W + b.
    wq, bq = nrm(ks[0], (D, D)), nrm(ks[1], (D,))
    wk, bk = nrm(ks[2], (D, D)), nrm(ks[3], (D,))
    wv, bv = nrm(ks[4], (D, D)), nrm(ks[5], (D,))
    wo, bo = nrm(ks[6], (D, D)), nrm(ks[7], (D,))
    w1, c1 = nrm(ks[8], (D, F)), nrm(ks[9], (F,))
    w2, c2 = nrm(ks[10], (F, D)), nrm(ks[11], (D,))

    # Fold 1/sqrt(head_dim) into the Q projection (mathematically identical to
    # scaling the scores before softmax; mask uses -inf so order is irrelevant).
    scale = 1.0 / (Hd ** 0.5)
    wq, bq = wq * scale, bq * scale

    def split_out_heads(w):       # (D, D) -> (H, D, Hd): head h = output cols h*Hd:(h+1)*Hd
        return jnp.transpose(w.reshape(D, H, Hd), (1, 0, 2))

    def split_bias(b):            # (D,) -> (H, 1, Hd)
        return b.reshape(H, 1, Hd)

    return {
        "n_head": H,
        "wq": split_out_heads(wq).astype(jnp.bfloat16), "bq": split_bias(bq),
        "wk": split_out_heads(wk).astype(jnp.bfloat16), "bk": split_bias(bk),
        "wv": split_out_heads(wv).astype(jnp.bfloat16), "bv": split_bias(bv),
        # out-proj: head h consumes input rows h*Hd:(h+1)*Hd -> (H, Hd, D)
        "wo": wo.reshape(H, Hd, D).astype(jnp.bfloat16), "bo": bo.reshape(1, D),
        "g1": jnp.ones((1, D), jnp.float32), "b1": jnp.zeros((1, D), jnp.float32),
        "g2": jnp.ones((1, D), jnp.float32), "b2": jnp.zeros((1, D), jnp.float32),
        "w1": w1.astype(jnp.bfloat16), "c1": c1.reshape(1, F),
        "w2": w2.astype(jnp.bfloat16), "c2": c2.reshape(1, D),
    }


if __name__ == "__main__":
    key = jax.random.PRNGKey(0)
    kx, kp = jax.random.split(key)

    B, S, D, H = 2, 8, 32, 4
    x = jax.random.normal(kx, (B, S, D), jnp.float32)
    params = init_params(kp, n_embd=D, n_head=H)

    out = residual_attention_block(x, params)
    jax.block_until_ready(out)
    assert out.shape == (B, S, D) and out.dtype == jnp.float32
    assert bool(jnp.all(jnp.isfinite(out)))
    print("KERNEL_OK")
</pallas_src>

<mosaic_0001>
module attributes {stable_mosaic.version = 11 : i64} {
  func.func @_block_kernel(%arg0: memref<2x8x32xf32, #tpu.memory_space<vmem>>, %arg1: memref<4x32x8xbf16, #tpu.memory_space<vmem>>, %arg2: memref<4x1x8xf32, #tpu.memory_space<vmem>>, %arg3: memref<4x32x8xbf16, #tpu.memory_space<vmem>>, %arg4: memref<4x1x8xf32, #tpu.memory_space<vmem>>, %arg5: memref<4x32x8xbf16, #tpu.memory_space<vmem>>, %arg6: memref<4x1x8xf32, #tpu.memory_space<vmem>>, %arg7: memref<4x8x32xbf16, #tpu.memory_space<vmem>>, %arg8: memref<1x32xf32, #tpu.memory_space<vmem>>, %arg9: memref<1x32xf32, #tpu.memory_space<vmem>>, %arg10: memref<1x32xf32, #tpu.memory_space<vmem>>, %arg11: memref<1x32xf32, #tpu.memory_space<vmem>>, %arg12: memref<1x32xf32, #tpu.memory_space<vmem>>, %arg13: memref<32x128xbf16, #tpu.memory_space<vmem>>, %arg14: memref<1x128xf32, #tpu.memory_space<vmem>>, %arg15: memref<128x32xbf16, #tpu.memory_space<vmem>>, %arg16: memref<1x32xf32, #tpu.memory_space<vmem>>, %arg17: memref<2x8x32xf32, #tpu.memory_space<vmem>>) attributes {dimension_semantics = [], scalar_prefetch = 0 : i64, scratch_operands = 0 : i64, tpu.core_type = #tpu.core_type<tc>} {
    %c0 = arith.constant 0 : index
    %c0_0 = arith.constant 0 : index
    %c0_1 = arith.constant 0 : index
    %0 = vector.load %arg0[%c0, %c0_0, %c0_1] : memref<2x8x32xf32, #tpu.memory_space<vmem>>, vector<2x8x32xf32>
    %1 = vector.shape_cast %0 : vector<2x8x32xf32> to vector<16x32xf32>
    %c0_2 = arith.constant 0 : index
    %c0_3 = arith.constant 0 : index
    %2 = vector.load %arg9[%c0_2, %c0_3] : memref<1x32xf32, #tpu.memory_space<vmem>>, vector<1x32xf32>
    %c0_4 = arith.constant 0 : index
    %c0_5 = arith.constant 0 : index
    %3 = vector.load %arg10[%c0_4, %c0_5] : memref<1x32xf32, #tpu.memory_space<vmem>>, vector<1x32xf32>
    %cst = arith.constant dense<0.000000e+00> : vector<16xf32>
    %4 = vector.multi_reduction <add>, %1, %cst [1] : vector<16x32xf32> to vector<16xf32>
    %5 = vector.shape_cast %4 : vector<16xf32> to vector<16x1xf32>
    %cst_6 = arith.constant 3.200000e+01 : f32
    %6 = vector.broadcast %cst_6 : f32 to vector<16x1xf32>
    %7 = arith.divf %5, %6 : vector<16x1xf32>
    %8 = vector.broadcast %7 : vector<16x1xf32> to vector<16x32xf32>
    %9 = arith.subf %1, %8 : vector<16x32xf32>
    %10 = arith.mulf %9, %9 : vector<16x32xf32>
    %cst_7 = arith.constant dense<0.000000e+00> : vector<16xf32>
    %11 = vector.multi_reduction <add>, %10, %cst_7 [1] : vector<16x32xf32> to vector<16xf32>
    %12 = vector.shape_cast %11 : vector<16xf32> to vector<16x1xf32>
    %cst_8 = arith.constant 3.200000e+01 : f32
    %13 = vector.broadcast %cst_8 : f32 to vector<16x1xf32>
    %14 = arith.divf %12, %13 : vector<16x1xf32>
    %15 = vector.broadcast %7 : vector<16x1xf32> to vector<16x32xf32>
    %16 = arith.subf %1, %15 : vector<16x32xf32>
    %cst_9 = arith.constant 9.99999974E-6 : f32
    %17 = vector.broadcast %cst_9 : f32 to vector<16x1xf32>
    %18 = arith.addf %14, %17 : vector<16x1xf32>
    %19 = math.rsqrt %18 : vector<16x1xf32>
    %20 = vector.broadcast %19 : vector<16x1xf32> to vector<16x32xf32>
    %21 = arith.mulf %16, %20 : vector<16x32xf32>
    %22 = vector.broadcast %2 : vector<1x32xf32> to vector<16x32xf32>
    %23 = arith.mulf %21, %22 : vector<16x32xf32>
    %24 = vector.broadcast %3 : vector<1x32xf32> to vector<16x32xf32>
    %25 = arith.addf %23, %24 : vector<16x32xf32>
    %26 = arith.truncf %25 : vector<16x32xf32> to vector<16x32xbf16>
    %c0_10 = arith.constant 0 : index
    %c0_11 = arith.constant 0 : index
    %c0_12 = arith.constant 0 : index
    %27 = vector.load %arg1[%c0_10, %c0_11, %c0_12] : memref<4x32x8xbf16, #tpu.memory_space<vmem>>, vector<1x32x8xbf16>
    %28 = vector.shape_cast %27 : vector<1x32x8xbf16> to vector<32x8xbf16>
    %cst_13 = arith.constant dense<0.000000e+00> : vector<16x8xf32>
    %29 = tpu.matmul %26, %28, %cst_13 {dimension_numbers = #tpu.dot_dimension_numbers<[1], [0], [0], [1], [0, 0, 1, 1], [], []>} : vector<16x32xbf16>, vector<32x8xbf16>, vector<16x8xf32> -> vector<16x8xf32>
    %c0_14 = arith.constant 0 : index
    %c0_15 = arith.constant 0 : index
    %c0_16 = arith.constant 0 : index
    %30 = vector.load %arg2[%c0_14, %c0_15, %c0_16] : memref<4x1x8xf32, #tpu.memory_space<vmem>>, vector<1x1x8xf32>
    %31 = vector.shape_cast %30 : vector<1x1x8xf32> to vector<1x8xf32>
    %32 = vector.broadcast %31 : vector<1x8xf32> to vector<16x8xf32>
    %33 = arith.addf %29, %32 : vector<16x8xf32>
    %34 = vector.shape_cast %33 : vector<16x8xf32> to vector<2x8x8xf32>
    %c0_17 = arith.constant 0 : index
    %c0_18 = arith.constant 0 : index
    %c0_19 = arith.constant 0 : index
    %35 = vector.load %arg3[%c0_17, %c0_18, %c0_19] : memref<4x32x8xbf16, #tpu.memory_space<vmem>>, vector<1x32x8xbf16>
    %36 = vector.shape_cast %35 : vector<1x32x8xbf16> to vector<32x8xbf16>
    %cst_20 = arith.constant dense<0.000000e+00> : vector<16x8xf32>
    %37 = tpu.matmul %26, %36, %cst_20 {dimension_numbers = #tpu.dot_dimension_numbers<[1], [0], [0], [1], [0, 0, 1, 1], [], []>} : vector<16x32xbf16>, vector<32x8xbf16>, vector<16x8xf32> -> vector<16x8xf32>
    %c0_21 = arith.constant 0 : index
    %c0_22 = arith.constant 0 : index
    %c0_23 = arith.constant 0 : index
    %38 = vector.load %arg4[%c0_21, %c0_22, %c0_23] : memref<4x1x8xf32, #tpu.memory_space<vmem>>, vector<1x1x8xf32>
    %39 = vector.shape_cast %38 : vector<1x1x8xf32> to vector<1x8xf32>
    %40 = vector.broadcast %39 : vector<1x8xf32> to vector<16x8xf32>
    %41 = arith.addf %37, %40 : vector<16x8xf32>
    %42 = vector.shape_cast %41 : vector<16x8xf32> to vector<2x8x8xf32>
    %c0_24 = arith.constant 0 : index
    %c0_25 = arith.constant 0 : index
    %c0_26 = arith.constant 0 : index
    %43 = vector.load %arg5[%c0_24, %c0_25, %c0_26] : memref<4x32x8xbf16, #tpu.memory_space<vmem>>, vector<1x32x8xbf16>
    %44 = vector.shape_cast %43 : vector<1x32x8xbf16> to vector<32x8xbf16>
    %cst_27 = arith.constant dense<0.000000e+00> : vector<16x8xf32>
    %45 = tpu.matmul %26, %44, %cst_27 {dimension_numbers = #tpu.dot_dimension_numbers<[1], [0], [0], [1], [0, 0, 1, 1], [], []>} : vector<16x32xbf16>, vector<32x8xbf16>, vector<16x8xf32> -> vector<16x8xf32>
    %c0_28 = arith.constant 0 : index
    %c0_29 = arith.constant 0 : index
    %c0_30 = arith.constant 0 : index
    %46 = vector.load %arg6[%c0_28, %c0_29, %c0_30] : memref<4x1x8xf32, #tpu.memory_space<vmem>>, vector<1x1x8xf32>
    %47 = vector.shape_cast %46 : vector<1x1x8xf32> to vector<1x8xf32>
    %48 = vector.broadcast %47 : vector<1x8xf32> to vector<16x8xf32>
    %49 = arith.addf %45, %48 : vector<16x8xf32>
    %50 = vector.shape_cast %49 : vector<16x8xf32> to vector<2x8x8xf32>
    %c1 = arith.constant 1 : index
    %c0_31 = arith.constant 0 : index
    %c0_32 = arith.constant 0 : index
    %51 = vector.load %arg1[%c1, %c0_31, %c0_32] : memref<4x32x8xbf16, #tpu.memory_space<vmem>>, vector<1x32x8xbf16>
    %52 = vector.shape_cast %51 : vector<1x32x8xbf16> to vector<32x8xbf16>
    %cst_33 = arith.constant dense<0.000000e+00> : vector<16x8xf32>
    %53 = tpu.matmul %26, %52, %cst_33 {dimension_numbers = #tpu.dot_dimension_numbers<[1], [0], [0], [1], [0, 0, 1, 1], [], []>} : vector<16x32xbf16>, vector<32x8xbf16>, vector<16x8xf32> -> vector<16x8xf32>
    %c1_34 = arith.constant 1 : index
    %c0_35 = arith.constant 0 : index
    %c0_36 = arith.constant 0 : index
    %54 = vector.load %arg2[%c1_34, %c0_35, %c0_36] : memref<4x1x8xf32, #tpu.memory_space<vmem>>, vector<1x1x8xf32>
    %55 = vector.shape_cast %54 : vector<1x1x8xf32> to vector<1x8xf32>
    %56 = vector.broadcast %55 : vector<1x8xf32> to vector<16x8xf32>
    %57 = arith.addf %53, %56 : vector<16x8xf32>
    %58 = vector.shape_cast %57 : vector<16x8xf32> to vector<2x8x8xf32>
    %c1_37 = arith.constant 1 : index
    %c0_38 = arith.constant 0 : index
    %c0_39 = arith.constant 0 : index
    %59 = vector.load %arg3[%c1_37, %c0_38, %c0_39] : memref<4x32x8xbf16, #tpu.memory_space<vmem>>, vector<1x32x8xbf16>
    %60 = vector.shape_cast %59 : vector<1x32x8xbf16> to vector<32x8xbf16>
    %cst_40 = arith.constant dense<0.000000e+00> : vector<16x8xf32>
    %61 = tpu.matmul %26, %60, %cst_40 {dimension_numbers = #tpu.dot_dimension_numbers<[1], [0], [0], [1], [0, 0, 1, 1], [], []>} : vector<16x32xbf16>, vector<32x8xbf16>, vector<16x8xf32> -> vector<16x8xf32>
    %c1_41 = arith.constant 1 : index
    %c0_42 = arith.constant 0 : index
    %c0_43 = arith.constant 0 : index
    %62 = vector.load %arg4[%c1_41, %c0_42, %c0_43] : memref<4x1x8xf32, #tpu.memory_space<vmem>>, vector<1x1x8xf32>
    %63 = vector.shape_cast %62 : vector<1x1x8xf32> to vector<1x8xf32>
    %64 = vector.broadcast %63 : vector<1x8xf32> to vector<16x8xf32>
    %65 = arith.addf %61, %64 : vector<16x8xf32>
    %66 = vector.shape_cast %65 : vector<16x8xf32> to vector<2x8x8xf32>
    %c1_44 = arith.constant 1 : index
    %c0_45 = arith.constant 0 : index
    %c0_46 = arith.constant 0 : index
    %67 = vector.load %arg5[%c1_44, %c0_45, %c0_46] : memref<4x32x8xbf16, #tpu.memory_space<vmem>>, vector<1x32x8xbf16>
    %68 = vector.shape_cast %67 : vector<1x32x8xbf16> to vector<32x8xbf16>
    %cst_47 = arith.constant dense<0.000000e+00> : vector<16x8xf32>
    %69 = tpu.matmul %26, %68, %cst_47 {dimension_numbers = #tpu.dot_dimension_numbers<[1], [0], [0], [1], [0, 0, 1, 1], [], []>} : vector<16x32xbf16>, vector<32x8xbf16>, vector<16x8xf32> -> vector<16x8xf32>
    %c1_48 = arith.constant 1 : index
    %c0_49 = arith.constant 0 : index
    %c0_50 = arith.constant 0 : index
    %70 = vector.load %arg6[%c1_48, %c0_49, %c0_50] : memref<4x1x8xf32, #tpu.memory_space<vmem>>, vector<1x1x8xf32>
    %71 = vector.shape_cast %70 : vector<1x1x8xf32> to vector<1x8xf32>
    %72 = vector.broadcast %71 : vector<1x8xf32> to vector<16x8xf32>
    %73 = arith.addf %69, %72 : vector<16x8xf32>
    %74 = vector.shape_cast %73 : vector<16x8xf32> to vector<2x8x8xf32>
    %c2 = arith.constant 2 : index
    %c0_51 = arith.constant 0 : index
    %c0_52 = arith.constant 0 : index
    %75 = vector.load %arg1[%c2, %c0_51, %c0_52] : memref<4x32x8xbf16, #tpu.memory_space<vmem>>, vector<1x32x8xbf16>
    %76 = vector.shape_cast %75 : vector<1x32x8xbf16> to vector<32x8xbf16>
    %cst_53 = arith.constant dense<0.000000e+00> : vector<16x8xf32>
    %77 = tpu.matmul %26, %76, %cst_53 {dimension_numbers = #tpu.dot_dimension_numbers<[1], [0], [0], [1], [0, 0, 1, 1], [], []>} : vector<16x32xbf16>, vector<32x8xbf16>, vector<16x8xf32> -> vector<16x8xf32>
    %c2_54 = arith.constant 2 : index
    %c0_55 = arith.constant 0 : index
    %c0_56 = arith.constant 0 : index
    %78 = vector.load %arg2[%c2_54, %c0_55, %c0_56] : memref<4x1x8xf32, #tpu.memory_space<vmem>>, vector<1x1x8xf32>
    %79 = vector.shape_cast %78 : vector<1x1x8xf32> to vector<1x8xf32>
    %80 = vector.broadcast %79 : vector<1x8xf32> to vector<16x8xf32>
    %81 = arith.addf %77, %80 : vector<16x8xf32>
    %82 = vector.shape_cast %81 : vector<16x8xf32> to vector<2x8x8xf32>
    %c2_57 = arith.constant 2 : index
    %c0_58 = arith.constant 0 : index
    %c0_59 = arith.constant 0 : index
    %83 = vector.load %arg3[%c2_57, %c0_58, %c0_59] : memref<4x32x8xbf16, #tpu.memory_space<vmem>>, vector<1x32x8xbf16>
    %84 = vector.shape_cast %83 : vector<1x32x8xbf16> to vector<32x8xbf16>
    %cst_60 = arith.constant dense<0.000000e+00> : vector<16x8xf32>
    %85 = tpu.matmul %26, %84, %cst_60 {dimension_numbers = #tpu.dot_dimension_numbers<[1], [0], [0], [1], [0, 0, 1, 1], [], []>} : vector<16x32xbf16>, vector<32x8xbf16>, vector<16x8xf32> -> vector<16x8xf32>
    %c2_61 = arith.constant 2 : index
    %c0_62 = arith.constant 0 : index
    %c0_63 = arith.constant 0 : index
    %86 = vector.load %arg4[%c2_61, %c0_62, %c0_63] : memref<4x1x8xf32, #tpu.memory_space<vmem>>, vector<1x1x8xf32>
    %87 = vector.shape_cast %86 : vector<1x1x8xf32> to vector<1x8xf32>
    %88 = vector.broadcast %87 : vector<1x8xf32> to vector<16x8xf32>
    %89 = arith.addf %85, %88 : vector<16x8xf32>
    %90 = vector.shape_cast %89 : vector<16x8xf32> to vector<2x8x8xf32>
    %c2_64 = arith.constant 2 : index
    %c0_65 = arith.constant 0 : index
    %c0_66 = arith.constant 0 : index
    %91 = vector.load %arg5[%c2_64, %c0_65, %c0_66] : memref<4x32x8xbf16, #tpu.memory_space<vmem>>, vector<1x32x8xbf16>
    %92 = vector.shape_cast %91 : vector<1x32x8xbf16> to vector<32x8xbf16>
    %cst_67 = arith.constant dense<0.000000e+00> : vector<16x8xf32>
    %93 = tpu.matmul %26, %92, %cst_67 {dimension_numbers = #tpu.dot_dimension_numbers<[1], [0], [0], [1], [0, 0, 1, 1], [], []>} : vector<16x32xbf16>, vector<32x8xbf16>, vector<16x8xf32> -> vector<16x8xf32>
    %c2_68 = arith.constant 2 : index
    %c0_69 = arith.constant 0 : index
    %c0_70 = arith.constant 0 : index
    %94 = vector.load %arg6[%c2_68, %c0_69, %c0_70] : memref<4x1x8xf32, #tpu.memory_space<vmem>>, vector<1x1x8xf32>
    %95 = vector.shape_cast %94 : vector<1x1x8xf32> to vector<1x8xf32>
    %96 = vector.broadcast %95 : vector<1x8xf32> to vector<16x8xf32>
    %97 = arith.addf %93, %96 : vector<16x8xf32>
    %98 = vector.shape_cast %97 : vector<16x8xf32> to vector<2x8x8xf32>
    %c3 = arith.constant 3 : index
    %c0_71 = arith.constant 0 : index
    %c0_72 = arith.constant 0 : index
    %99 = vector.load %arg1[%c3, %c0_71, %c0_72] : memref<4x32x8xbf16, #tpu.memory_space<vmem>>, vector<1x32x8xbf16>
    %100 = vector.shape_cast %99 : vector<1x32x8xbf16> to vector<32x8xbf16>
    %cst_73 = arith.constant dense<0.000000e+00> : vector<16x8xf32>
    %101 = tpu.matmul %26, %100, %cst_73 {dimension_numbers = #tpu.dot_dimension_numbers<[1], [0], [0], [1], [0, 0, 1, 1], [], []>} : vector<16x32xbf16>, vector<32x8xbf16>, vector<16x8xf32> -> vector<16x8xf32>
    %c3_74 = arith.constant 3 : index
    %c0_75 = arith.constant 0 : index
    %c0_76 = arith.constant 0 : index
    %102 = vector.load %arg2[%c3_74, %c0_75, %c0_76] : memref<4x1x8xf32, #tpu.memory_space<vmem>>, vector<1x1x8xf32>
    %103 = vector.shape_cast %102 : vector<1x1x8xf32> to vector<1x8xf32>
    %104 = vector.broadcast %103 : vector<1x8xf32> to vector<16x8xf32>
    %105 = arith.addf %101, %104 : vector<16x8xf32>
    %106 = vector.shape_cast %105 : vector<16x8xf32> to vector<2x8x8xf32>
    %c3_77 = arith.constant 3 : index
    %c0_78 = arith.constant 0 : index
    %c0_79 = arith.constant 0 : index
    %107 = vector.load %arg3[%c3_77, %c0_78, %c0_79] : memref<4x32x8xbf16, #tpu.memory_space<vmem>>, vector<1x32x8xbf16>
    %108 = vector.shape_cast %107 : vector<1x32x8xbf16> to vector<32x8xbf16>
    %cst_80 = arith.constant dense<0.000000e+00> : vector<16x8xf32>
    %109 = tpu.matmul %26, %108, %cst_80 {dimension_numbers = #tpu.dot_dimension_numbers<[1], [0], [0], [1], [0, 0, 1, 1], [], []>} : vector<16x32xbf16>, vector<32x8xbf16>, vector<16x8xf32> -> vector<16x8xf32>
    %c3_81 = arith.constant 3 : index
    %c0_82 = arith.constant 0 : index
    %c0_83 = arith.constant 0 : index
    %110 = vector.load %arg4[%c3_81, %c0_82, %c0_83] : memref<4x1x8xf32, #tpu.memory_space<vmem>>, vector<1x1x8xf32>
    %111 = vector.shape_cast %110 : vector<1x1x8xf32> to vector<1x8xf32>
    %112 = vector.broadcast %111 : vector<1x8xf32> to vector<16x8xf32>
    %113 = arith.addf %109, %112 : vector<16x8xf32>
    %114 = vector.shape_cast %113 : vector<16x8xf32> to vector<2x8x8xf32>
    %c3_84 = arith.constant 3 : index
    %c0_85 = arith.constant 0 : index
    %c0_86 = arith.constant 0 : index
    %115 = vector.load %arg5[%c3_84, %c0_85, %c0_86] : memref<4x32x8xbf16, #tpu.memory_space<vmem>>, vector<1x32x8xbf16>
    %116 = vector.shape_cast %115 : vector<1x32x8xbf16> to vector<32x8xbf16>
    %cst_87 = arith.constant dense<0.000000e+00> : vector<16x8xf32>
    %117 = tpu.matmul %26, %116, %cst_87 {dimension_numbers = #tpu.dot_dimension_numbers<[1], [0], [0], [1], [0, 0, 1, 1], [], []>} : vector<16x32xbf16>, vector<32x8xbf16>, vector<16x8xf32> -> vector<16x8xf32>
    %c3_88 = arith.constant 3 : index
    %c0_89 = arith.constant 0 : index
    %c0_90 = arith.constant 0 : index
    %118 = vector.load %arg6[%c3_88, %c0_89, %c0_90] : memref<4x1x8xf32, #tpu.memory_space<vmem>>, vector<1x1x8xf32>
    %119 = vector.shape_cast %118 : vector<1x1x8xf32> to vector<1x8xf32>
    %120 = vector.broadcast %119 : vector<1x8xf32> to vector<16x8xf32>
    %121 = arith.addf %117, %120 : vector<16x8xf32>
    %122 = vector.shape_cast %121 : vector<16x8xf32> to vector<2x8x8xf32>
    %123 = tpu.concatenate %34, %58, %82, %106 in 0 : vector<2x8x8xf32>, vector<2x8x8xf32>, vector<2x8x8xf32>, vector<2x8x8xf32> -> vector<8x8x8xf32>
    %124 = tpu.concatenate %42, %66, %90, %114 in 0 : vector<2x8x8xf32>, vector<2x8x8xf32>, vector<2x8x8xf32>, vector<2x8x8xf32> -> vector<8x8x8xf32>
    %125 = tpu.concatenate %50, %74, %98, %122 in 0 : vector<2x8x8xf32>, vector<2x8x8xf32>, vector<2x8x8xf32>, vector<2x8x8xf32> -> vector<8x8x8xf32>
    %126 = tpu.iota {dimensions = array<i32: 0>} : vector<8x8xi32>
    %127 = tpu.iota {dimensions = array<i32: 1>} : vector<8x8xi32>
    %128 = arith.cmpi sgt, %127, %126 : vector<8x8xi32>
    %cst_91 = arith.constant -3.40282347E+38 : f32
    %cst_92 = arith.constant 0.000000e+00 : f32
    %129 = vector.broadcast %cst_91 : f32 to vector<8x8xf32>
    %130 = vector.broadcast %cst_92 : f32 to vector<8x8xf32>
    %131 = arith.select %128, %129, %130 : vector<8x8xi1>, vector<8x8xf32>
    %132 = vector.shape_cast %131 : vector<8x8xf32> to vector<1x8x8xf32>
    "tpu.trace_start"() <{level = 10 : i32, message = "nqd,nkd->nqk"}> : () -> ()
    %cst_93 = arith.constant dense<0.000000e+00> : vector<8x8x8xf32>
    %133 = tpu.matmul %123, %124, %cst_93 {dimension_numbers = #tpu.dot_dimension_numbers<[2], [2], [1], [1], [0, 0, 0, 1, 1, 1], [0], [0]>} : vector<8x8x8xf32>, vector<8x8x8xf32>, vector<8x8x8xf32> -> vector<8x8x8xf32>
    "tpu.trace_stop"() : () -> ()
    %134 = vector.broadcast %132 : vector<1x8x8xf32> to vector<8x8x8xf32>
    %135 = arith.addf %133, %134 : vector<8x8x8xf32>
    %cst_94 = arith.constant dense<0xFF800000> : vector<8x8xf32>
    %136 = vector.multi_reduction <maximumf>, %135, %cst_94 [2] : vector<8x8x8xf32> to vector<8x8xf32>
    %137 = vector.shape_cast %136 : vector<8x8xf32> to vector<8x8x1xf32>
    %138 = vector.broadcast %137 : vector<8x8x1xf32> to vector<8x8x8xf32>
    %139 = arith.subf %135, %138 : vector<8x8x8xf32>
    %140 = math.exp %139 : vector<8x8x8xf32>
    %cst_95 = arith.constant dense<0.000000e+00> : vector<8x8xf32>
    %141 = vector.multi_reduction <add>, %140, %cst_95 [2] : vector<8x8x8xf32> to vector<8x8xf32>
    %142 = vector.shape_cast %141 : vector<8x8xf32> to vector<8x8x1xf32>
    %143 = tpu.reciprocal %142 {approx = true} : vector<8x8x1xf32> -> vector<8x8x1xf32>
    %144 = vector.broadcast %143 : vector<8x8x1xf32> to vector<8x8x8xf32>
    %145 = arith.mulf %140, %144 : vector<8x8x8xf32>
    "tpu.trace_start"() <{level = 10 : i32, message = "nqk,nkd->nqd"}> : () -> ()
    %cst_96 = arith.constant dense<0.000000e+00> : vector<8x8x8xf32>
    %146 = tpu.matmul %145, %125, %cst_96 {dimension_numbers = #tpu.dot_dimension_numbers<[2], [1], [1], [2], [0, 0, 0, 1, 1, 2], [0], [0]>} : vector<8x8x8xf32>, vector<8x8x8xf32>, vector<8x8x8xf32> -> vector<8x8x8xf32>
    "tpu.trace_stop"() : () -> ()
    %147 = vector.shape_cast %146 : vector<8x8x8xf32> to vector<4x2x8x8xf32>
    %148 = vector.extract_strided_slice %147 {offsets = [0, 0, 0, 0], sizes = [1, 2, 8, 8], strides = [1, 1, 1, 1]} : vector<4x2x8x8xf32> to vector<1x2x8x8xf32>
    %149 = vector.shape_cast %148 : vector<1x2x8x8xf32> to vector<2x8x8xf32>
    %150 = vector.shape_cast %149 : vector<2x8x8xf32> to vector<16x8xf32>
    %151 = arith.truncf %150 : vector<16x8xf32> to vector<16x8xbf16>
    %c0_97 = arith.constant 0 : index
    %c0_98 = arith.constant 0 : index
    %c0_99 = arith.constant 0 : index
    %152 = vector.load %arg7[%c0_97, %c0_98, %c0_99] : memref<4x8x32xbf16, #tpu.memory_space<vmem>>, vector<1x8x32xbf16>
    %153 = vector.shape_cast %152 : vector<1x8x32xbf16> to vector<8x32xbf16>
    %cst_100 = arith.constant dense<0.000000e+00> : vector<16x32xf32>
    %154 = tpu.matmul %151, %153, %cst_100 {dimension_numbers = #tpu.dot_dimension_numbers<[1], [0], [0], [1], [0, 0, 1, 1], [], []>} : vector<16x8xbf16>, vector<8x32xbf16>, vector<16x32xf32> -> vector<16x32xf32>
    %155 = vector.extract_strided_slice %147 {offsets = [1, 0, 0, 0], sizes = [1, 2, 8, 8], strides = [1, 1, 1, 1]} : vector<4x2x8x8xf32> to vector<1x2x8x8xf32>
    %156 = vector.shape_cast %155 : vector<1x2x8x8xf32> to vector<2x8x8xf32>
    %157 = vector.shape_cast %156 : vector<2x8x8xf32> to vector<16x8xf32>
    %158 = arith.truncf %157 : vector<16x8xf32> to vector<16x8xbf16>
    %c1_101 = arith.constant 1 : index
    %c0_102 = arith.constant 0 : index
    %c0_103 = arith.constant 0 : index
    %159 = vector.load %arg7[%c1_101, %c0_102, %c0_103] : memref<4x8x32xbf16, #tpu.memory_space<vmem>>, vector<1x8x32xbf16>
    %160 = vector.shape_cast %159 : vector<1x8x32xbf16> to vector<8x32xbf16>
    %cst_104 = arith.constant dense<0.000000e+00> : vector<16x32xf32>
    %161 = tpu.matmul %158, %160, %cst_104 {dimension_numbers = #tpu.dot_dimension_numbers<[1], [0], [0], [1], [0, 0, 1, 1], [], []>} : vector<16x8xbf16>, vector<8x32xbf16>, vector<16x32xf32> -> vector<16x32xf32>
    %162 = arith.addf %154, %161 : vector<16x32xf32>
    %163 = vector.extract_strided_slice %147 {offsets = [2, 0, 0, 0], sizes = [1, 2, 8, 8], strides = [1, 1, 1, 1]} : vector<4x2x8x8xf32> to vector<1x2x8x8xf32>
    %164 = vector.shape_cast %163 : vector<1x2x8x8xf32> to vector<2x8x8xf32>
    %165 = vector.shape_cast %164 : vector<2x8x8xf32> to vector<16x8xf32>
    %166 = arith.truncf %165 : vector<16x8xf32> to vector<16x8xbf16>
    %c2_105 = arith.constant 2 : index
    %c0_106 = arith.constant 0 : index
    %c0_107 = arith.constant 0 : index
    %167 = vector.load %arg7[%c2_105, %c0_106, %c0_107] : memref<4x8x32xbf16, #tpu.memory_space<vmem>>, vector<1x8x32xbf16>
    %168 = vector.shape_cast %167 : vector<1x8x32xbf16> to vector<8x32xbf16>
    %cst_108 = arith.constant dense<0.000000e+00> : vector<16x32xf32>
    %169 = tpu.matmul %166, %168, %cst_108 {dimension_numbers = #tpu.dot_dimension_numbers<[1], [0], [0], [1], [0, 0, 1, 1], [], []>} : vector<16x8xbf16>, vector<8x32xbf16>, vector<16x32xf32> -> vector<16x32xf32>
    %170 = arith.addf %162, %169 : vector<16x32xf32>
    %171 = vector.extract_strided_slice %147 {offsets = [3, 0, 0, 0], sizes = [1, 2, 8, 8], strides = [1, 1, 1, 1]} : vector<4x2x8x8xf32> to vector<1x2x8x8xf32>
    %172 = vector.shape_cast %171 : vector<1x2x8x8xf32> to vector<2x8x8xf32>
    %173 = vector.shape_cast %172 : vector<2x8x8xf32> to vector<16x8xf32>
    %174 = arith.truncf %173 : vector<16x8xf32> to vector<16x8xbf16>
    %c3_109 = arith.constant 3 : index
    %c0_110 = arith.constant 0 : index
    %c0_111 = arith.constant 0 : index
    %175 = vector.load %arg7[%c3_109, %c0_110, %c0_111] : memref<4x8x32xbf16, #tpu.memory_space<vmem>>, vector<1x8x32xbf16>
    %176 = vector.shape_cast %175 : vector<1x8x32xbf16> to vector<8x32xbf16>
    %cst_112 = arith.constant dense<0.000000e+00> : vector<16x32xf32>
    %177 = tpu.matmul %174, %176, %cst_112 {dimension_numbers = #tpu.dot_dimension_numbers<[1], [0], [0], [1], [0, 0, 1, 1], [], []>} : vector<16x8xbf16>, vector<8x32xbf16>, vector<16x32xf32> -> vector<16x32xf32>
    %178 = arith.addf %170, %177 : vector<16x32xf32>
    %c0_113 = arith.constant 0 : index
    %c0_114 = arith.constant 0 : index
    %179 = vector.load %arg8[%c0_113, %c0_114] : memref<1x32xf32, #tpu.memory_space<vmem>>, vector<1x32xf32>
    %180 = vector.broadcast %179 : vector<1x32xf32> to vector<16x32xf32>
    %181 = arith.addf %178, %180 : vector<16x32xf32>
    %182 = arith.addf %1, %181 : vector<16x32xf32>
    %c0_115 = arith.constant 0 : index
    %c0_116 = arith.constant 0 : index
    %183 = vector.load %arg11[%c0_115, %c0_116] : memref<1x32xf32, #tpu.memory_space<vmem>>, vector<1x32xf32>
    %c0_117 = arith.constant 0 : index
    %c0_118 = arith.constant 0 : index
    %184 = vector.load %arg12[%c0_117, %c0_118] : memref<1x32xf32, #tpu.memory_space<vmem>>, vector<1x32xf32>
    %cst_119 = arith.constant dense<0.000000e+00> : vector<16xf32>
    %185 = vector.multi_reduction <add>, %182, %cst_119 [1] : vector<16x32xf32> to vector<16xf32>
    %186 = vector.shape_cast %185 : vector<16xf32> to vector<16x1xf32>
    %cst_120 = arith.constant 3.200000e+01 : f32
    %187 = vector.broadcast %cst_120 : f32 to vector<16x1xf32>
    %188 = arith.divf %186, %187 : vector<16x1xf32>
    %189 = vector.broadcast %188 : vector<16x1xf32> to vector<16x32xf32>
    %190 = arith.subf %182, %189 : vector<16x32xf32>
    %191 = arith.mulf %190, %190 : vector<16x32xf32>
    %cst_121 = arith.constant dense<0.000000e+00> : vector<16xf32>
    %192 = vector.multi_reduction <add>, %191, %cst_121 [1] : vector<16x32xf32> to vector<16xf32>
    %193 = vector.shape_cast %192 : vector<16xf32> to vector<16x1xf32>
    %cst_122 = arith.constant 3.200000e+01 : f32
    %194 = vector.broadcast %cst_122 : f32 to vector<16x1xf32>
    %195 = arith.divf %193, %194 : vector<16x1xf32>
    %196 = vector.broadcast %188 : vector<16x1xf32> to vector<16x32xf32>
    %197 = arith.subf %182, %196 : vector<16x32xf32>
    %cst_123 = arith.constant 9.99999974E-6 : f32
    %198 = vector.broadcast %cst_123 : f32 to vector<16x1xf32>
    %199 = arith.addf %195, %198 : vector<16x1xf32>
    %200 = math.rsqrt %199 : vector<16x1xf32>
    %201 = vector.broadcast %200 : vector<16x1xf32> to vector<16x32xf32>
    %202 = arith.mulf %197, %201 : vector<16x32xf32>
    %203 = vector.broadcast %183 : vector<1x32xf32> to vector<16x32xf32>
    %204 = arith.mulf %202, %203 : vector<16x32xf32>
    %205 = vector.broadcast %184 : vector<1x32xf32> to vector<16x32xf32>
    %206 = arith.addf %204, %205 : vector<16x32xf32>
    %207 = arith.truncf %206 : vector<16x32xf32> to vector<16x32xbf16>
    %c0_124 = arith.constant 0 : index
    %c0_125 = arith.constant 0 : index
    %208 = vector.load %arg13[%c0_124, %c0_125] : memref<32x128xbf16, #tpu.memory_space<vmem>>, vector<32x128xbf16>
    %cst_126 = arith.constant dense<0.000000e+00> : vector<16x128xf32>
    %209 = tpu.matmul %207, %208, %cst_126 {dimension_numbers = #tpu.dot_dimension_numbers<[1], [0], [0], [1], [0, 0, 1, 1], [], []>} : vector<16x32xbf16>, vector<32x128xbf16>, vector<16x128xf32> -> vector<16x128xf32>
    %c0_127 = arith.constant 0 : index
    %c0_128 = arith.constant 0 : index
    %210 = vector.load %arg14[%c0_127, %c0_128] : memref<1x128xf32, #tpu.memory_space<vmem>>, vector<1x128xf32>
    %211 = vector.broadcast %210 : vector<1x128xf32> to vector<16x128xf32>
    %212 = arith.addf %209, %211 : vector<16x128xf32>
    %cst_129 = arith.constant 1.702000e+00 : f32
    %213 = vector.broadcast %cst_129 : f32 to vector<16x128xf32>
    %214 = arith.mulf %213, %212 : vector<16x128xf32>
    %215 = arith.negf %214 : vector<16x128xf32>
    %216 = math.exp %215 : vector<16x128xf32>
    %cst_130 = arith.constant 1.000000e+00 : f32
    %217 = vector.broadcast %cst_130 : f32 to vector<16x128xf32>
    %218 = arith.addf %217, %216 : vector<16x128xf32>
    %219 = arith.divf %217, %218 : vector<16x128xf32>
    %220 = arith.mulf %212, %219 : vector<16x128xf32>
    %221 = arith.truncf %220 : vector<16x128xf32> to vector<16x128xbf16>
    %c0_131 = arith.constant 0 : index
    %c0_132 = arith.constant 0 : index
    %222 = vector.load %arg15[%c0_131, %c0_132] : memref<128x32xbf16, #tpu.memory_space<vmem>>, vector<128x32xbf16>
    %cst_133 = arith.constant dense<0.000000e+00> : vector<16x32xf32>
    %223 = tpu.matmul %221, %222, %cst_133 {dimension_numbers = #tpu.dot_dimension_numbers<[1], [0], [0], [1], [0, 0, 1, 1], [], []>} : vector<16x128xbf16>, vector<128x32xbf16>, vector<16x32xf32> -> vector<16x32xf32>
    %c0_134 = arith.constant 0 : index
    %c0_135 = arith.constant 0 : index
    %224 = vector.load %arg16[%c0_134, %c0_135] : memref<1x32xf32, #tpu.memory_space<vmem>>, vector<1x32xf32>
    %225 = vector.broadcast %224 : vector<1x32xf32> to vector<16x32xf32>
    %226 = arith.addf %223, %225 : vector<16x32xf32>
    %227 = arith.addf %182, %226 : vector<16x32xf32>
    %228 = vector.shape_cast %227 : vector<16x32xf32> to vector<2x8x32xf32>
    %c0_136 = arith.constant 0 : index
    %c0_137 = arith.constant 0 : index
    %c0_138 = arith.constant 0 : index
    %229 = vector.load %arg17[%c0_136, %c0_137, %c0_138] : memref<2x8x32xf32, #tpu.memory_space<vmem>>, vector<2x8x32xf32>
    tpu.vector_store %arg17[%c0_136, %c0_137, %c0_138], %228 {strides = array<i32>} : memref<2x8x32xf32, #tpu.memory_space<vmem>>, vector<2x8x32xf32>,
    return
  }
}

</mosaic_0001>

<bundles_post_ra>
// kernel: tpu_custom_call.1
= control target key start
LH: loop header
LB: loop body
LE: loop exit
PB: predicated region body
PF: predicated region fallthrough
CT: control target
= control target key end

     0   :  { %s3776_s0 = inlined_call_operand.vmem [shape: f32[2,8,32], index: 0, kind: input, shape index: {}]   ;;  %s3777_s1 = inlined_call_operand.vmem [shape: bf16[4,32,8], index: 1, kind: input, shape index: {}]   ;;  %s3778_s2 = inlined_call_operand.vmem [shape: f32[4,1,8], index: 2, kind: input, shape index: {}]   ;;  %s3779_s3 = inlined_call_operand.vmem [shape: bf16[4,32,8], index: 3, kind: input, shape index: {}]   ;;  %s3780_s4 = inlined_call_operand.vmem [shape: f32[4,1,8], index: 4, kind: input, shape index: {}]   ;;  %s3781_s5 = inlined_call_operand.vmem [shape: bf16[4,32,8], index: 5, kind: input, shape index: {}]   ;;  %s3782_s6 = inlined_call_operand.vmem [shape: f32[4,1,8], index: 6, kind: input, shape index: {}]   ;;  %s3783_s7 = inlined_call_operand.vmem [shape: bf16[4,8,32], index: 7, kind: input, shape index: {}]   ;;  %s3784_s8 = inlined_call_operand.vmem [shape: f32[1,32], index: 8, kind: input, shape index: {}]   ;;  %s3785_s9 = inlined_call_operand.vmem [shape: f32[1,32], index: 9, kind: input, shape index: {}]   ;;  %s3786_s10 = inlined_call_operand.vmem [shape: f32[1,32], index: 10, kind: input, shape index: {}]   ;;  %s3787_s11 = inlined_call_operand.vmem [shape: f32[1,32], index: 11, kind: input, shape index: {}]   ;;  %s3788_s12 = inlined_call_operand.vmem [shape: f32[1,32], index: 12, kind: input, shape index: {}]   ;;  %s3789_s13 = inlined_call_operand.vmem [shape: bf16[32,128], index: 13, kind: input, shape index: {}]   ;;  %s3790_s14 = inlined_call_operand.vmem [shape: f32[1,128], index: 14, kind: input, shape index: {}]   ;;  %s3791_s15 = inlined_call_operand.vmem [shape: bf16[128,32], index: 15, kind: input, shape index: {}]   ;;  %s3792_s16 = inlined_call_operand.vmem [shape: f32[1,32], index: 16, kind: input, shape index: {}]   ;;  %s3793_s17 = inlined_call_operand.hbm [shape: f32[2,8,32], index: 17, kind: output, shape index: {}]  }
   0x1   :  { %3796 = sst [smem:[#allocation5_spill]] %s3776_s0 }
   0x2   :  { %3797 = sst [smem:[#allocation6_spill]] %s3777_s1 }
   0x3   :  { %s3798_s26 = sld [smem:[#allocation5_spill]]  ;;  %vm62_vm0 = vcmask 261120  }
   0x9   :  { %v58_v0 = vld [vmem:[%s3798_s26] sm:$0xff]  ;;  %v59_v1 = vld [vmem:[%s3798_s26 + $0x8] sm:$0xff] }
   0xa   :  { %v63_v2 = vsel %vm62_vm0, %v58_v0, 0.0  ;;  %v66_v3 = vsel %vm62_vm0, %v59_v1, 0.0 }
   0xb   :  { %64 = vadd.xlane.f32.xlu0 %v63_v2 }
   0xf   :  { %67 = vadd.xlane.f32.xlu0 %v66_v3 }
  0x10   :  { %22 = vsyncpa [#allocation3], 0  ;;  %s3799_s30 = sld [smem:[#allocation6_spill]]  ;;  %v3232_v16 = vmov 0.0   ;;  %vm3233_vm1 = vmmov 0   ;;  %v3128_v35 = vld [vmem:[%s3779_s3] sm:$0xff]  }
  0x11   :  { %2891 = vmatprep.subr.bf16.mxu0 %v3232_v16  ;;  %2915 = vmatprep.subr.bf16.mxu1 %v3232_v16  ;;  %v2659_v27 = vld [vmem:[%s3785_s9] ss:$0 sm:$0xff]  ;;  %v3129_v36 = vld [vmem:[%s3781_s5 + $0x10] sm:$0xff]   ;;  %v3130_v38 = vld [vmem:[%s3779_s3 + $0x8] sm:$0xff]   ;;  %vm902_vm2 = vcmask 64512   ;;  %vm2191_vm4 = vcmask 1043456  }
  0x12   :  { %2895 = vmatprep.mubr.msk.bf16.mxu0 %vm3233_vm1, %v3232_v16  ;;  %2919 = vmatprep.mubr.msk.bf16.mxu1 %vm3233_vm1, %v3232_v16  ;;  %v2660_v31 = vld [vmem:[%s3786_s10] ss:$0 sm:$0xff]  ;;  %v3131_v39 = vld [vmem:[%s3781_s5 + $0x18] sm:$0xff]   ;;  %v3134_v42 = vld [vmem:[%s3781_s5 + $0x8] sm:$0xff]   ;;  %s3234_s19 = smov [#allocation2]  }
  0x13   :  { %v3132_v40 = vld [vmem:[%s3781_s5] sm:$0xff]   ;;  %v3135_v43 = vld [vmem:[%s3779_s3 + $0x28] sm:$0xff]   ;;  %v3136_v44 = vld [vmem:[%s3779_s3 + $0x10] sm:$0xff]  }
  0x14   :  { %v3133_v41 = vld [vmem:[%s3779_s3 + $0x20] sm:$0xff]   ;;  %v3138_v46 = vld [vmem:[%s3779_s3 + $0x18] sm:$0xff]   ;;  %v3141_v49 = vld [vmem:[%s3781_s5 + $0x30] sm:$0xff]  }
  0x15   :  { %v3143_v51 = vld [vmem:[%s3781_s5 + $0x38] sm:$0xff]   ;;  %v3144_v52 = vld [vmem:[%s3781_s5 + $0x20] sm:$0xff]   ;;  %v3145_v53 = vld [vmem:[%s3781_s5 + $0x28] sm:$0xff]  }
  0x16   :  { %v3124_v14 = vld [vmem:[%s3799_s30] sm:$0xff]   ;;  %v3125_v15 = vld [vmem:[%s3799_s30 + $0x10] sm:$0xff]   ;;  %v3126_v17 = vld [vmem:[%s3799_s30 + $0x8] sm:$0xff]  }
  0x17   :  { %2892 = vmatpush3.bf16.msra.mxu0 %v3124_v14  ;;  %2916 = vmatpush3.bf16.msra.mxu1 %v3125_v15  ;;  %v3127_v18 = vld [vmem:[%s3799_s30 + $0x18] sm:$0xff]   ;;  %v3137_v45 = vld [vmem:[%s3799_s30 + $0x30] sm:$0xff]   ;;  %v3140_v48 = vld [vmem:[%s3799_s30 + $0x20] sm:$0xff]  }
  0x18   :  { %2893 = vmatprep.subr.bf16.mxu0 %v3232_v16  ;;  %2917 = vmatprep.subr.bf16.mxu1 %v3232_v16  ;;  %v3139_v47 = vld [vmem:[%s3799_s30 + $0x38] sm:$0xff]   ;;  %v3142_v50 = vld [vmem:[%s3799_s30 + $0x28] sm:$0xff]   ;;  %v3146_v54 = vld [vmem:[%s3779_s3 + $0x30] sm:$0xff]  }
  0x19   :  { %v3147_v55 = vld [vmem:[%s3779_s3 + $0x38] sm:$0xff]   ;;  %v2661_v3 = vld [vmem:[%s3778_s2] ss:$0 sm:$0xff] }
  0x1b   :  { %2894 = vmatpush3.bf16.msra.mxu0 %v3126_v17  ;;  %2918 = vmatpush3.bf16.msra.mxu1 %v3127_v18 }
  0x1c   :  { %2899 = vmatprep.subr.bf16.mxu0 %v3232_v16  ;;  %2931 = vmatprep.subr.bf16.mxu1 %v3232_v16 }
  0x98   :  { %v65_v4 = vpop.xlane.xlu0 %64 }
  0x99   :  { %v70_v5 = vmul.f32 0.03125, %v65_v4 }
  0x9b   :  { %v72_v6 = vsub.f32 %v58_v0, %v70_v5  ;;  %v2665_v0 = vld [vmem:[%s3780_s4] ss:$0 sm:$0xff] }
  0x9c   :  { %v68_v7 = vpop.xlane.xlu0 %67 }
  0x9d   :  { %v71_v8 = vmul.f32 0.03125, %v68_v7  ;;  %v74_v9 = vmul.f32 %v72_v6, %v72_v6 }
  0x9f   :  { %v73_v10 = vsub.f32 %v59_v1, %v71_v8  ;;  %v76_v11 = vsel %vm62_vm0, %v74_v9, 0.0 }
  0xa0   :  { %77 = vadd.xlane.f32.xlu1 %v76_v11 }
  0xa1   :  { %v75_v12 = vmul.f32 %v73_v10, %v73_v10 }
  0xa3   :  { %v79_v13 = vsel %vm62_vm0, %v75_v12, 0.0 }
  0xa4   :  { %80 = vadd.xlane.f32.xlu1 %v79_v13 }
 0x12d   :  { %v78_v19 = vpop.xlane.xlu1 %77 }
 0x12e   :  { %v82_v20 = vmul.f32 0.03125, %v78_v19 }
 0x130   :  { %v84_v21 = vadd.f32 1e-05, %v82_v20 }
 0x131   :  { %v81_v22 = vpop.xlane.xlu1 %80 }
 0x132   :  { %3158 = vrsqrt.f32 %v84_v21  ;;  %v83_v23 = vmul.f32 0.03125, %v81_v22 }
 0x134   :  { %v85_v24 = vadd.f32 1e-05, %v83_v23  ;;  %v2687_v23 = vld [vmem:[%s3780_s4 + $0x1] ss:$0 sm:$0xff] }
 0x136   :  { %3160 = vrsqrt.f32 %v85_v24 }
 0x13c   :  { %v3159_v25 = vpop.eup %3158 }
 0x13d   :  { %v88_v26 = vmul.f32 %v3159_v25, %v72_v6 }
 0x13f   :  { %v96_v29 = vmul.f32 %v2659_v27, %v88_v26  ;;  %v2678_v26 = vld [vmem:[%s3778_s2 + $0x1] ss:$0 sm:$0xff] }
 0x140   :  { %v3161_v28 = vpop.eup %3160 }
 0x141   :  { %v89_v30 = vmul.f32 %v3161_v28, %v73_v10  ;;  %v104_v33 = vadd.f32 %v2660_v31, %v96_v29 }
 0x143   :  { %v97_v32 = vmul.f32 %v2659_v27, %v89_v30  ;;  %v2714_v30 = vld [vmem:[%s3780_s4 + $0x2] ss:$0 sm:$0xff] }
 0x145   :  { %v105_v34 = vadd.f32 %v2660_v31, %v97_v32 }
 0x147   :  { %v3371_v37 = vpack.c.bf16 %v105_v34, %v104_v33 }
 0x149   :  { %2896 = vmatmul.mubr.msk.bf16.vlgmr.msra.gmra.mrb[0].mxu0 %vm62_vm0, %v3371_v37  ;;  %2920 = vmatmul.mubr.msk.bf16.vlgmr.msra.gmra.mrb[0].mxu1 %vm62_vm0, %v3371_v37 }
 0x14a   :  { %2900 = vmatpush3.bf16.msra.mxu0 %v3128_v35  ;;  %2932 = vmatpush3.bf16.msra.mxu1 %v3129_v36 }
 0x14b   :  { %2901 = vmatprep.subr.bf16.mxu0 %v3232_v16  ;;  %2933 = vmatprep.subr.bf16.mxu1 %v3232_v16 }
 0x14c   :  { %2903 = vmatprep.mubr.msk.bf16.mxu0 %vm3233_vm1, %v3232_v16  ;;  %2935 = vmatprep.mubr.msk.bf16.mxu1 %vm3233_vm1, %v3232_v16 }
 0x14e   :  { %2902 = vmatpush3.bf16.msra.mxu0 %v3130_v38  ;;  %2934 = vmatpush3.bf16.msra.mxu1 %v3131_v39  ;;  %v2705_v39 = vld [vmem:[%s3778_s2 + $0x2] ss:$0 sm:$0xff] }
 0x14f   :  { %2907 = vmatprep.subr.bf16.mxu0 %v3232_v16  ;;  %2947 = vmatprep.subr.bf16.mxu1 %v3232_v16 }
 0x151   :  { %2904 = vmatmul.mubr.msk.bf16.vlgmr.msra.gmra.mrb[4].mxu0 %vm62_vm0, %v3371_v37  ;;  %2936 = vmatmul.mubr.msk.bf16.vlgmr.msra.gmra.mrb[4].mxu1 %vm62_vm0, %v3371_v37 }
 0x152   :  { %2908 = vmatpush3.bf16.msra.mxu0 %v3132_v40  ;;  %2948 = vmatpush3.bf16.msra.mxu1 %v3133_v41 }
 0x153   :  { %2909 = vmatprep.subr.bf16.mxu0 %v3232_v16  ;;  %2949 = vmatprep.subr.bf16.mxu1 %v3232_v16 }
 0x154   :  { %2911 = vmatprep.mubr.msk.bf16.mxu0 %vm3233_vm1, %v3232_v16  ;;  %2951 = vmatprep.mubr.msk.bf16.mxu1 %vm3233_vm1, %v3232_v16 }
 0x156   :  { %2910 = vmatpush3.bf16.msra.mxu0 %v3134_v42  ;;  %2950 = vmatpush3.bf16.msra.mxu1 %v3135_v43 }
 0x157   :  { %2923 = vmatprep.subr.bf16.mxu0 %v3232_v16  ;;  %2963 = vmatprep.subr.bf16.mxu1 %v3232_v16 }
 0x159   :  { %2912 = vmatmul.mubr.msk.bf16.vlgmr.msra.gmra.mrb[8].mxu0 %vm62_vm0, %v3371_v37  ;;  %2952 = vmatmul.mubr.msk.bf16.vlgmr.msra.gmra.mrb[8].mxu1 %vm62_vm0, %v3371_v37 }
 0x15a   :  { %2924 = vmatpush3.bf16.msra.mxu0 %v3136_v44  ;;  %2964 = vmatpush3.bf16.msra.mxu1 %v3137_v45 }
 0x15b   :  { %2925 = vmatprep.subr.bf16.mxu0 %v3232_v16  ;;  %2965 = vmatprep.subr.bf16.mxu1 %v3232_v16 }
 0x15c   :  { %2927 = vmatprep.mubr.msk.bf16.mxu0 %vm3233_vm1, %v3232_v16  ;;  %2967 = vmatprep.mubr.msk.bf16.mxu1 %vm3233_vm1, %v3232_v16 }
 0x15e   :  { %2926 = vmatpush3.bf16.msra.mxu0 %v3138_v46  ;;  %2966 = vmatpush3.bf16.msra.mxu1 %v3139_v47 }
 0x15f   :  { %2939 = vmatprep.subr.bf16.mxu0 %v3232_v16  ;;  %2979 = vmatprep.subr.bf16.mxu1 %v3232_v16 }
 0x161   :  { %2928 = vmatmul.mubr.msk.bf16.vlgmr.msra.gmra.mrb[12].mxu0 %vm62_vm0, %v3371_v37  ;;  %2968 = vmatmul.mubr.msk.bf16.vlgmr.msra.gmra.mrb[12].mxu1 %vm62_vm0, %v3371_v37 }
 0x162   :  { %2940 = vmatpush3.bf16.msra.mxu0 %v3140_v48  ;;  %2980 = vmatpush3.bf16.msra.mxu1 %v3141_v49 }
 0x163   :  { %2941 = vmatprep.subr.bf16.mxu0 %v3232_v16  ;;  %2981 = vmatprep.subr.bf16.mxu1 %v3232_v16 }
 0x164   :  { %2943 = vmatprep.mubr.msk.bf16.mxu0 %vm3233_vm1, %v3232_v16  ;;  %2983 = vmatprep.mubr.msk.bf16.mxu1 %vm3233_vm1, %v3232_v16 }
 0x166   :  { %2942 = vmatpush3.bf16.msra.mxu0 %v3142_v50  ;;  %2982 = vmatpush3.bf16.msra.mxu1 %v3143_v51 }
 0x167   :  { %2955 = vmatprep.subr.bf16.mxu0 %v3232_v16  ;;  %3002 = vmatprep.subr.mxu1 %v3232_v16 }
 0x169   :  { %2944 = vmatmul.mubr.msk.bf16.vlgmr.msra.gmra.mrb[16].mxu0 %vm62_vm0, %v3371_v37  ;;  %2984 = vmatmul.mubr.msk.bf16.vlgmr.msra.gmra.mrb[16].mxu1 %vm62_vm0, %v3371_v37 }
 0x16a   :  { %2956 = vmatpush3.bf16.msra.mxu0 %v3144_v52  ;;  %2959 = vmatprep.mubr.msk.bf16.mxu0 %vm3233_vm1, %v3232_v16 }
 0x16b   :  { %2957 = vmatprep.subr.bf16.mxu0 %v3232_v16  ;;  %3004 = vmatprep.mubr.msk.f32.mxu1 %vm3233_vm1, %v3232_v16 }
 0x16e   :  { %2958 = vmatpush3.bf16.msra.mxu0 %v3145_v53 }
 0x16f   :  { %2971 = vmatprep.subr.bf16.mxu0 %v3232_v16 }
 0x171   :  { %2960 = vmatmul.mubr.msk.bf16.vlgmr.msra.gmra.mrb[20].mxu0 %vm62_vm0, %v3371_v37 }
 0x172   :  { %2972 = vmatpush3.bf16.msra.mxu0 %v3146_v54  ;;  %2975 = vmatprep.mubr.msk.bf16.mxu0 %vm3233_vm1, %v3232_v16 }
 0x173   :  { %2973 = vmatprep.subr.bf16.mxu0 %v3232_v16 }
 0x176   :  { %2974 = vmatpush3.bf16.msra.mxu0 %v3147_v55  ;;  %v2741_v55 = vld [vmem:[%s3780_s4 + $0x3] ss:$0 sm:$0xff] }
 0x177   :  { %2987 = vmatprep.subr.mxu0 %v3232_v16 }
 0x179   :  { %2976 = vmatmul.mubr.msk.bf16.vlgmr.msra.gmra.mrb[24].mxu0 %vm62_vm0, %v3371_v37 }
 0x17a   :  { %2989 = vmatprep.mubr.msk.f32.mxu0 %vm3233_vm1, %v3232_v16 }
 0x21c   :  { %v167_v56 = vpop.f32.mrb[0].mxu0  ;;  %v361_v57 = vpop.f32.mrb[0].mxu1 }
 0x21d   :  { %v2897_v58 = vpop.f32.mrb[1].mxu0  ;;  %v2921_v59 = vpop.f32.mrb[1].mxu1  ;;  %v168_v11 = vadd.f32 %v2661_v3, %v167_v56  ;;  %v362_v36 = vadd.f32 %v2678_v26, %v361_v57  ;;  %v2732_v57 = vld [vmem:[%s3778_s2 + $0x3] ss:$0 sm:$0xff] }
 0x21e   :  { %v170_v60 = vpop.f32.mrb[2].mxu0  ;;  %v364_v61 = vpop.f32.mrb[2].mxu1 }
 0x21f   :  { %v2898_v62 = vpop.f32.mrb[3].mxu0  ;;  %v2922_v63 = vpop.f32.mrb[3].mxu1  ;;  %v171_v13 = vadd.f32 %v2661_v3, %v170_v60  ;;  %v365_v38 = vadd.f32 %v2678_v26, %v364_v61  ;;  %v2669_v60 = vld [vmem:[%s3782_s6] ss:$0 sm:$0xff] }
 0x224   :  { %v231_v1 = vpop.f32.mrb[4].mxu0  ;;  %v3498_v2 = vpop.f32.mrb[4].mxu1 }
 0x225   :  { %v232_v4 = vadd.f32 %v2665_v0, %v231_v1  ;;  %v2905_v5 = vpop.f32.mrb[5].mxu0  ;;  %v2937_v6 = vpop.f32.mrb[5].mxu1 }
 0x226   :  { %v234_v7 = vpop.f32.mrb[6].mxu0  ;;  %v3503_v8 = vpop.f32.mrb[6].mxu1  ;;  %v896_v5 = vlaneseq }
 0x227   :  { %v2906_v9 = vpop.f32.mrb[7].mxu0  ;;  %v2938_v10 = vpop.f32.mrb[7].mxu1  ;;  %2988 = vmatpush3.xpose.msk.msra.mxu0 %vm902_vm2, %v232_v4  ;;  %v235_v12 = vadd.f32 %v2665_v0, %v234_v7 }
 0x228   :  { %2992 = vmatprep.subr.mxu0 %v3232_v16  ;;  %v897_v6 = vshrl.u32 %v896_v5, 7  ;;  %v899_v7 = vand.u32 127, %v896_v5 }
 0x22a   :  { %2990 = vmatmul.mubr.msk.f32.vlgmr.msra.gmra.mrb[28].mxu0 %vm902_vm2, %v168_v11  ;;  %vm900_vm3 = vcmp.gt.s32.totalorder %v899_v7, %v897_v6 }
 0x22b   :  { %2993 = vmatpush3.xpose.msk.msra.mxu0 %vm902_vm2, %v235_v12  ;;  %2994 = vmatprep.mubr.msk.f32.mxu0 %vm3233_vm1, %v3232_v16  ;;  %v901_v9 = vsel %vm900_vm3, -3.4028235e+38, %v3232_v16 }
 0x22c   :  { %v3511_v14 = vpop.f32.mrb[8].mxu0  ;;  %v625_v15 = vpop.f32.mrb[8].mxu1  ;;  %2997 = vmatprep.subr.mxu0 %v3232_v16 }
 0x22d   :  { %v2913_v17 = vpop.f32.mrb[9].mxu0  ;;  %v2953_v18 = vpop.f32.mrb[9].mxu1  ;;  %v626_v37 = vadd.f32 %v2714_v30, %v625_v15  ;;  %v296_v1 = vadd.f32 %v2669_v60, %v3511_v14 }
 0x22e   :  { %v3514_v19 = vpop.f32.mrb[10].mxu0  ;;  %v628_v20 = vpop.f32.mrb[10].mxu1  ;;  %2995 = vmatmul.mubr.msk.f32.vlgmr.msra.gmra.mrb[30].mxu0 %vm902_vm2, %v171_v13 }
 0x22f   :  { %v2914_v21 = vpop.f32.mrb[11].mxu0  ;;  %v2954_v22 = vpop.f32.mrb[11].mxu1  ;;  %2999 = vmatprep.mubr.msk.f32.mxu0 %vm3233_vm1, %v3232_v16  ;;  %v629_v40 = vadd.f32 %v2714_v30, %v628_v20  ;;  %v299_v4 = vadd.f32 %v2669_v60, %v3514_v19 }
 0x234   :  { %v427_v24 = vpop.f32.mrb[12].mxu0  ;;  %v757_v25 = vpop.f32.mrb[12].mxu1 }
 0x235   :  { %v428_v27 = vadd.f32 %v2687_v23, %v427_v24  ;;  %v2929_v28 = vpop.f32.mrb[13].mxu0  ;;  %v2969_v29 = vpop.f32.mrb[13].mxu1  ;;  %v758_v0 = vadd.f32 %v2732_v57, %v757_v25 }
 0x236   :  { %v430_v31 = vpop.f32.mrb[14].mxu0  ;;  %v760_v32 = vpop.f32.mrb[14].mxu1 }
 0x237   :  { %v431_v33 = vadd.f32 %v2687_v23, %v430_v31  ;;  %v2930_v34 = vpop.f32.mrb[15].mxu0  ;;  %v2970_v35 = vpop.f32.mrb[15].mxu1  ;;  %2998 = vmatpush3.xpose.msk.msra.mxu0 %vm902_vm2, %v428_v27  ;;  %v761_v3 = vadd.f32 %v2732_v57, %v760_v32 }
 0x238   :  { %3007 = vmatprep.subr.mxu0 %v3232_v16 }
 0x239   :  { %3003 = vmatpush3.xpose.msk.msra.mxu1 %vm902_vm2, %v431_v33 }
 0x23a   :  { %3000 = vmatmul.mubr.msk.f32.vlgmr.msra.gmra.mrb[32].mxu0 %vm902_vm2, %v362_v36  ;;  %3012 = vmatprep.subr.mxu1 %v3232_v16 }
 0x23b   :  { %3008 = vmatpush3.xpose.msk.msra.mxu0 %vm902_vm2, %v626_v37  ;;  %3009 = vmatprep.mubr.msk.f32.mxu0 %vm3233_vm1, %v3232_v16 }
 0x23c   :  { %v559_v41 = vpop.f32.mrb[16].mxu0  ;;  %v3539_v42 = vpop.f32.mrb[16].mxu1  ;;  %3005 = vmatmul.mubr.msk.f32.vlgmr.msra.gmra.mrb[20].mxu1 %vm902_vm2, %v365_v38  ;;  %3017 = vmatprep.subr.mxu0 %v3232_v16 }
 0x23d   :  { %v560_v43 = vadd.f32 %v2705_v39, %v559_v41  ;;  %v2945_v44 = vpop.f32.mrb[17].mxu0  ;;  %v2985_v45 = vpop.f32.mrb[17].mxu1  ;;  %3013 = vmatpush3.xpose.msk.msra.mxu1 %vm902_vm2, %v629_v40  ;;  %3014 = vmatprep.mubr.msk.f32.mxu1 %vm3233_vm1, %v3232_v16 }
 0x23e   :  { %v562_v46 = vpop.f32.mrb[18].mxu0  ;;  %v3546_v47 = vpop.f32.mrb[18].mxu1  ;;  %3022 = vmatprep.subr.mxu1 %v3232_v16 }
 0x23f   :  { %v563_v48 = vadd.f32 %v2705_v39, %v562_v46  ;;  %v2946_v49 = vpop.f32.mrb[19].mxu0  ;;  %v2986_v50 = vpop.f32.mrb[19].mxu1  ;;  %3010 = vmatmul.mubr.msk.f32.vlgmr.msra.gmra.mrb[34].mxu0 %vm902_vm2, %v560_v43 }
 0x240   :  { %3019 = vmatprep.mubr.msk.f32.mxu0 %vm3233_vm1, %v3232_v16 }
 0x241   :  { %3015 = vmatmul.mubr.msk.f32.vlgmr.msra.gmra.mrb[22].mxu1 %vm902_vm2, %v563_v48 }
 0x242   :  { %3024 = vmatprep.mubr.msk.f32.mxu1 %vm3233_vm1, %v3232_v16 }
 0x244   :  { %v3555_v51 = vpop.f32.mrb[20].mxu0 }
 0x245   :  { %v2961_v52 = vpop.f32.mrb[21].mxu0 }
 0x246   :  { %v3557_v53 = vpop.f32.mrb[22].mxu0 }
 0x247   :  { %v2962_v54 = vpop.f32.mrb[23].mxu0 }
 0x24c   :  { %v823_v56 = vpop.f32.mrb[24].mxu0 }
 0x24d   :  { %v824_v58 = vadd.f32 %v2741_v55, %v823_v56  ;;  %v2977_v59 = vpop.f32.mrb[25].mxu0 }
 0x24e   :  { %v826_v61 = vpop.f32.mrb[26].mxu0 }
 0x24f   :  { %v827_v62 = vadd.f32 %v2741_v55, %v826_v61  ;;  %v2978_v63 = vpop.f32.mrb[27].mxu0  ;;  %3018 = vmatpush3.xpose.msk.msra.mxu0 %vm902_vm2, %v824_v58 }
 0x250   :  { %3027 = vmatprep.subr.mxu0 %v3232_v16 }
 0x251   :  { %3023 = vmatpush3.xpose.msk.msra.mxu1 %vm902_vm2, %v827_v62 }
 0x252   :  { %3020 = vmatmul.mubr.msk.f32.vlgmr.msra.gmra.mrb[36].mxu0 %vm902_vm2, %v758_v0  ;;  %3032 = vmatprep.subr.mxu1 %v3232_v16 }
 0x253   :  { %3028 = vmatpush3.msra.mxu0 %v296_v1  ;;  %3029 = vmatprep.mubr.msk.f32.mxu0 %vm3233_vm1, %v3232_v16 }
 0x254   :  { %3025 = vmatmul.mubr.msk.f32.vlgmr.msra.gmra.mrb[24].mxu1 %vm902_vm2, %v761_v3  ;;  %3037 = vmatprep.subr.mxu0 %v3232_v16 }
 0x255   :  { %3033 = vmatpush3.msra.mxu1 %v299_v4  ;;  %3034 = vmatprep.mubr.msk.f32.mxu1 %vm3233_vm1, %v3232_v16 }
 0x256   :  { %3042 = vmatprep.subr.mxu1 %v3232_v16 }
 0x2fd   :  { %v975_v10 = vpop.f32.mrb[28].mxu0 }
 0x2fe   :  { %v976_v11 = vadd.f32 %v975_v10, %v901_v9  ;;  %v2991_v12 = vpop.f32.mrb[29].mxu0 }
 0x300   :  { %v1511_v13 = vsel %vm902_vm2, %v976_v11, -inf }
 0x301   :  { %1512 = vmax.xlane.f32.xlu0 %v1511_v13  ;;  %v1051_v14 = vpop.f32.mrb[30].mxu0 }
 0x302   :  { %v1052_v15 = vadd.f32 %v1051_v14, %v901_v9  ;;  %v2996_v17 = vpop.f32.mrb[31].mxu0 }
 0x304   :  { %v1514_v18 = vsel %vm902_vm2, %v1052_v15, -inf }
 0x305   :  { %1515 = vmax.xlane.f32.xlu1 %v1514_v18 }
 0x30d   :  { %v1127_v19 = vpop.f32.mrb[32].mxu0 }
 0x30e   :  { %v1128_v20 = vadd.f32 %v1127_v19, %v901_v9  ;;  %v3001_v21 = vpop.f32.mrb[33].mxu0 }
 0x30f   :  { %v1203_v22 = vpop.f32.mrb[20].mxu1 }
 0x310   :  { %v1204_v23 = vadd.f32 %v1203_v22, %v901_v9  ;;  %v3006_v24 = vpop.f32.mrb[21].mxu1  ;;  %v1517_v25 = vsel %vm902_vm2, %v1128_v20, -inf }
 0x311   :  { %1518 = vmax.xlane.f32.xlu0 %v1517_v25 }
 0x312   :  { %v1279_v26 = vpop.f32.mrb[34].mxu0  ;;  %v1520_v27 = vsel %vm902_vm2, %v1204_v23, -inf }
 0x313   :  { %v1280_v28 = vadd.f32 %v1279_v26, %v901_v9  ;;  %1521 = vmax.xlane.f32.xlu1 %v1520_v27  ;;  %v3011_v29 = vpop.f32.mrb[35].mxu0 }
 0x314   :  { %v1355_v30 = vpop.f32.mrb[22].mxu1 }
 0x315   :  { %v1356_v31 = vadd.f32 %v1355_v30, %v901_v9  ;;  %v3016_v32 = vpop.f32.mrb[23].mxu1  ;;  %v1523_v33 = vsel %vm902_vm2, %v1280_v28, -inf }
 0x316   :  { %1524 = vmax.xlane.f32.xlu0 %v1523_v33 }
 0x317   :  { %v1526_v34 = vsel %vm902_vm2, %v1356_v31, -inf }
 0x318   :  { %1527 = vmax.xlane.f32.xlu1 %v1526_v34 }
 0x325   :  { %v1431_v35 = vpop.f32.mrb[36].mxu0 }
 0x326   :  { %v1432_v36 = vadd.f32 %v1431_v35, %v901_v9  ;;  %v3021_v37 = vpop.f32.mrb[37].mxu0 }
 0x327   :  { %v1507_v38 = vpop.f32.mrb[24].mxu1 }
 0x328   :  { %v1508_v39 = vadd.f32 %v1507_v38, %v901_v9  ;;  %v3026_v40 = vpop.f32.mrb[25].mxu1  ;;  %v1529_v41 = vsel %vm902_vm2, %v1432_v36, -inf  ;;  %v2723_v38 = vld [vmem:[%s3782_s6 + $0x2] ss:$0 sm:$0xff] }
 0x329   :  { %1530 = vmax.xlane.f32.xlu0 %v1529_v41  ;;  %v692_v41 = vadd.f32 %v2723_v38, %v3555_v51 }
 0x32a   :  { %v1532_v43 = vsel %vm902_vm2, %v1508_v39, -inf }
 0x32b   :  { %1533 = vmax.xlane.f32.xlu1 %v1532_v43 }
 0x38e   :  { %v1513_v44 = vpop.xlane.xlu0 %1512 }
 0x38f   :  { %v1535_v45 = vsub.f32 %v976_v11, %v1513_v44  ;;  %v2750_v44 = vld [vmem:[%s3782_s6 + $0x3] ss:$0 sm:$0xff] }
 0x391   :  { %v1543_v46 = vmul.f32 1.442695, %v1535_v45  ;;  %v695_v45 = vadd.f32 %v2723_v38, %v3557_v53 }
 0x392   :  { %v1516_v48 = vpop.xlane.xlu1 %1515 }
 0x393   :  { %3162 = vpow2.f32 %v1543_v46  ;;  %v1536_v49 = vsub.f32 %v1052_v15, %v1516_v48 }
 0x395   :  { %v1545_v50 = vmul.f32 1.442695, %v1536_v49  ;;  %v890_v49 = vadd.f32 %v2750_v44, %v3539_v42 }
 0x397   :  { %3164 = vpow2.f32 %v1545_v50  ;;  %v893_v50 = vadd.f32 %v2750_v44, %v3546_v47 }
 0x39d   :  { %v3163_v52 = vpop.eup %3162 }
 0x39e   :  { %v1519_v54 = vpop.xlane.xlu0 %1518  ;;  %v1559_v55 = vsel %vm902_vm2, %v3163_v52, 0.0 }
 0x39f   :  { %v1537_v56 = vsub.f32 %v1128_v20, %v1519_v54  ;;  %1560 = vadd.xlane.f32.xlu0 %v1559_v55 }
 0x3a0   :  { %v1522_v57 = vpop.xlane.xlu1 %1521 }
 0x3a1   :  { %v3165_v58 = vpop.eup %3164  ;;  %v1547_v59 = vmul.f32 1.442695, %v1537_v56  ;;  %v1538_v60 = vsub.f32 %v1204_v23, %v1522_v57  ;;  %v2184_v57 = vld [vmem:[%s3783_s7] sm:$0xf] }
 0x3a2   :  { %v1562_v61 = vsel %vm902_vm2, %v3165_v58, 0.0 }
 0x3a3   :  { %3166 = vpow2.f32 %v1547_v59  ;;  %v1549_v62 = vmul.f32 1.442695, %v1538_v60  ;;  %1563 = vadd.xlane.f32.xlu1 %v1562_v61  ;;  %v1525_v63 = vpop.xlane.xlu0 %1524  ;;  %v2778_v59 = vld [vmem:[%s3783_s7 + $0x4] sm:$0xf] }
 0x3a4   :  { %v1539_v0 = vsub.f32 %v1280_v28, %v1525_v63  ;;  %v2696_v28 = vld [vmem:[%s3782_s6 + $0x1] ss:$0 sm:$0xff]  ;;  %v2193_v60 = vsel %vm2191_vm4, %v2778_v59, 0  ;;  %v2783_v63 = vld [vmem:[%s3783_s7 + $0xc] sm:$0xf] }
 0x3a5   :  { %3168 = vpow2.f32 %v1549_v62  ;;  %v1528_v1 = vpop.xlane.xlu1 %1527  ;;  %v497_v35 = vadd.f32 %v2696_v28, %v3503_v8 }
 0x3a6   :  { %v1551_v3 = vmul.f32 1.442695, %v1539_v0  ;;  %v1540_v4 = vsub.f32 %v1356_v31, %v1528_v1  ;;  %v494_v31 = vadd.f32 %v2696_v28, %v3498_v2 }
 0x3a8   :  { %3170 = vpow2.f32 %v1551_v3  ;;  %v1553_v5 = vmul.f32 1.442695, %v1540_v4  ;;  %v2342_v4 = vsel %vm2191_vm4, %v2783_v63, 0  ;;  %v3148_v63 = vld [vmem:[%s3789_s13] sm:$0xff]  }
 0x3aa   :  { %3172 = vpow2.f32 %v1553_v5 }
 0x3ad   :  { %v3167_v6 = vpop.eup %3166 }
 0x3ae   :  { %v1565_v7 = vsel %vm902_vm2, %v3167_v6, 0.0 }
 0x3af   :  { %v3169_v9 = vpop.eup %3168  ;;  %1566 = vadd.xlane.f32.xlu0 %v1565_v7 }
 0x3b0   :  { %v1568_v10 = vsel %vm902_vm2, %v3169_v9, 0.0 }
 0x3b1   :  { %1569 = vadd.xlane.f32.xlu1 %v1568_v10 }
 0x3b2   :  { %v3171_v11 = vpop.eup %3170 }
 0x3b3   :  { %v1571_v12 = vsel %vm902_vm2, %v3171_v11, 0.0 }
 0x3b4   :  { %v3596_v13 = vpop.eup %3172  ;;  %1572 = vadd.xlane.f32.xlu0 %v1571_v12 }
 0x3b5   :  { %v1574_v14 = vsel %vm902_vm2, %v3596_v13, 0.0 }
 0x3b6   :  { %1575 = vadd.xlane.f32.xlu1 %v1574_v14  ;;  %v1531_v15 = vpop.xlane.xlu0 %1530 }
 0x3b7   :  { %v1541_v17 = vsub.f32 %v1432_v36, %v1531_v15 }
 0x3b8   :  { %v1534_v18 = vpop.xlane.xlu1 %1533 }
 0x3b9   :  { %v1555_v19 = vmul.f32 1.442695, %v1541_v17  ;;  %v1542_v20 = vsub.f32 %v1508_v39, %v1534_v18 }
 0x3bb   :  { %3174 = vpow2.f32 %v1555_v19  ;;  %v1557_v21 = vmul.f32 1.442695, %v1542_v20 }
 0x3bd   :  { %3176 = vpow2.f32 %v1557_v21 }
 0x3c5   :  { %v3600_v22 = vpop.eup %3174 }
 0x3c6   :  { %v1577_v23 = vsel %vm902_vm2, %v3600_v22, 0.0 }
 0x3c7   :  { %v3604_v24 = vpop.eup %3176  ;;  %1578 = vadd.xlane.f32.xlu0 %v1577_v23 }
 0x3c8   :  { %v1580_v25 = vsel %vm902_vm2, %v3604_v24, 0.0 }
 0x3c9   :  { %1581 = vadd.xlane.f32.xlu1 %v1580_v25 }
 0x42c   :  { %v1561_v26 = vpop.xlane.xlu0 %1560 }
 0x42d   :  { %3178 = vrcp.f32 %v1561_v26 }
 0x430   :  { %v1564_v27 = vpop.xlane.xlu1 %1563 }
 0x431   :  { %3180 = vrcp.f32 %v1564_v27 }
 0x437   :  { %v3179_v29 = vpop.eup %3178 }
 0x438   :  { %v1591_v30 = vmul.f32 %v3179_v29, %v3163_v52 }
 0x43a   :  { %3030 = vmatmul.mubr.msk.f32.vlgmr.msra.gmra.mrb[38].mxu0 %vm902_vm2, %v1591_v30 }
 0x43b   :  { %v3181_v32 = vpop.eup %3180  ;;  %3038 = vmatpush3.msra.mxu0 %v494_v31  ;;  %3039 = vmatprep.mubr.msk.f32.mxu0 %vm3233_vm1, %v3232_v16 }
 0x43c   :  { %v1592_v33 = vmul.f32 %v3181_v32, %v3165_v58  ;;  %v1567_v34 = vpop.xlane.xlu0 %1566  ;;  %3047 = vmatprep.subr.mxu0 %v3232_v16  ;;  %v2240_v58 = vsel %vm2191_vm4, %v2184_v57, 0 }
 0x43d   :  { %3182 = vrcp.f32 %v1567_v34 }
 0x43e   :  { %3035 = vmatmul.mubr.msk.f32.vlgmr.msra.gmra.mrb[26].mxu1 %vm902_vm2, %v1592_v33  ;;  %v1570_v36 = vpop.xlane.xlu1 %1569 }
 0x43f   :  { %3043 = vmatpush3.msra.mxu1 %v497_v35  ;;  %3184 = vrcp.f32 %v1570_v36  ;;  %3044 = vmatprep.mubr.msk.f32.mxu1 %vm3233_vm1, %v3232_v16 }
 0x440   :  { %3052 = vmatprep.subr.mxu1 %v3232_v16 }
 0x441   :  { %v1573_v2 = vpop.xlane.xlu0 %1572 }
 0x442   :  { %3186 = vrcp.f32 %v1573_v2 }
 0x443   :  { %v1576_v37 = vpop.xlane.xlu1 %1575 }
 0x444   :  { %3188 = vrcp.f32 %v1576_v37 }
 0x447   :  { %v3183_v8 = vpop.eup %3182 }
 0x448   :  { %v1593_v39 = vmul.f32 %v3183_v8, %v3167_v6  ;;  %v2781_v6 = vld [vmem:[%s3783_s7 + $0x8] sm:$0xf] }
 0x449   :  { %v3185_v40 = vpop.eup %3184  ;;  %v2290_v12 = vsel %vm2191_vm4, %v2781_v6, 0 }
 0x44a   :  { %v1594_v43 = vmul.f32 %v3185_v40, %v3169_v9  ;;  %3040 = vmatmul.mubr.msk.f32.vlgmr.msra.gmra.mrb[40].mxu0 %vm902_vm2, %v1593_v39  ;;  %v2785_v39 = vld [vmem:[%s3784_s8] ss:$0 sm:$0xff]  ;;  %s2648_s8 = sshll.u32 %s3234_s19, 4  ;;  %s2649_s8 = int_to_ptr.vmem [resolvable:$true] %s2648_s8 }
 0x44b   :  { %3048 = vmatpush3.msra.mxu0 %v692_v41  ;;  %3049 = vmatprep.mubr.msk.f32.mxu0 %vm3233_vm1, %v3232_v16  ;;  %p3213_p1 = scmp.lt.s32.totalorder %s2649_s8, %s2649_s8 }
 0x44c   :  { %v3187_v46 = vpop.eup %3186  ;;  %3045 = vmatmul.mubr.msk.f32.vlgmr.msra.gmra.mrb[28].mxu1 %vm902_vm2, %v1594_v43  ;;  %3057 = vmatprep.subr.mxu0 %v3232_v16 }
 0x44d   :  { %v1595_v48 = vmul.f32 %v3187_v46, %v3171_v11  ;;  %3053 = vmatpush3.msra.mxu1 %v695_v45  ;;  %3054 = vmatprep.mubr.msk.f32.mxu1 %vm3233_vm1, %v3232_v16 }
 0x44e   :  { %v3189_v51 = vpop.eup %3188  ;;  %3062 = vmatprep.subr.mxu1 %v3232_v16 }
 0x44f   :  { %v1596_v53 = vmul.f32 %v3189_v51, %v3596_v13  ;;  %3050 = vmatmul.mubr.msk.f32.vlgmr.msra.gmra.mrb[42].mxu0 %vm902_vm2, %v1595_v48  ;;  %v3206_v48 = vld [vmem:[%s3798_s26] sm:$0xff] }
 0x450   :  { %3058 = vmatpush3.msra.mxu0 %v890_v49  ;;  %3059 = vmatprep.mubr.msk.f32.mxu0 %vm3233_vm1, %v3232_v16 }
 0x451   :  { %3055 = vmatmul.mubr.msk.f32.vlgmr.msra.gmra.mrb[30].mxu1 %vm902_vm2, %v1596_v53  ;;  %3067 = vmatprep.subr.bf16.mxu0 %v3232_v16  ;;  %v3207_v53 = vld [vmem:[%s3798_s26 + $0x8] sm:$0xff]  ;;  %s3208_s26 = scalar_lea.vmem %s2649_s8, 256 }
 0x452   :  { %3063 = vmatpush3.msra.mxu1 %v893_v50  ;;  %3064 = vmatprep.mubr.msk.f32.mxu1 %vm3233_vm1, %v3232_v16  ;;  %p3209_p0 = scmp.ne.s32.totalorder %s2649_s8, %s3208_s26  ;;  %p3214_p2 = scmp.lt.s32.totalorder %s3208_s26, %s3208_s26 }
 0x453   :  { %3073 = vmatprep.subr.bf16.mxu1 %v3232_v16 }
 0x454   :  { %v1579_v42 = vpop.xlane.xlu0 %1578  ;;  %p3215_p3 = por %p3214_p2, %p3213_p1 }
 0x455   :  { %3190 = vrcp.f32 %v1579_v42 }
 0x456   :  { %v1582_v52 = vpop.xlane.xlu1 %1581  ;;  %p3216_p4 = pnand %p3215_p3, %p3209_p0 }
 0x457   :  { %3192 = vrcp.f32 %v1582_v52 }
 0x45f   :  { %v3191_v54 = vpop.eup %3190 }
 0x460   :  { %v1597_v47 = vmul.f32 %v3191_v54, %v3600_v22 }
 0x461   :  { %v3193_v55 = vpop.eup %3192 }
 0x462   :  { %v1598_v56 = vmul.f32 %v3193_v55, %v3604_v24  ;;  %3060 = vmatmul.mubr.msk.f32.vlgmr.msra.gmra.mrb[44].mxu0 %vm902_vm2, %v1597_v47 }
 0x463   :  { %3069 = vmatprep.mubr.msk.bf16.mxu0 %vm3233_vm1, %v3232_v16  ;;  %3068 = vmatpush3.bf16.msra.mxu0 %v2193_v60 }
 0x464   :  { %3065 = vmatmul.mubr.msk.f32.vlgmr.msra.gmra.mrb[32].mxu1 %vm902_vm2, %v1598_v56  ;;  %3079 = vmatprep.subr.bf16.mxu0 %v3232_v16 }
 0x465   :  { %3075 = vmatprep.mubr.msk.bf16.mxu1 %vm3233_vm1, %v3232_v16  ;;  %3074 = vmatpush3.bf16.msra.mxu1 %v2240_v58 }
 0x466   :  { %3085 = vmatprep.subr.bf16.mxu1 %v3232_v16 }
 0x50d   :  { %v1668_v61 = vpop.f32.mrb[38].mxu0 }
 0x50e   :  { %v3031_v62 = vpop.f32.mrb[39].mxu0 }
 0x511   :  { %v1741_v0 = vpop.f32.mrb[26].mxu1 }
 0x512   :  { %v2183_v1 = vpack.c.bf16 %v1741_v0, %v1668_v61  ;;  %v3036_v3 = vpop.f32.mrb[27].mxu1  ;;  %v3149_v0 = vld [vmem:[%s3789_s13 + $0x8] sm:$0xff]  }
 0x514   :  { %3076 = vmatmul.mubr.msk.bf16.vlgmr.msra.gmra.mrb[36].mxu1 %vm902_vm2, %v2183_v1 }
 0x515   :  { %3086 = vmatpush3.bf16.msra.mxu1 %v2342_v4  ;;  %3087 = vmatprep.mubr.msk.bf16.mxu1 %vm3233_vm1, %v3232_v16 }
 0x516   :  { %3099 = vmatprep.subr.bf16.mxu1 %v3232_v16 }
 0x51d   :  { %v1814_v5 = vpop.f32.mrb[40].mxu0 }
 0x51e   :  { %v3041_v7 = vpop.f32.mrb[41].mxu0 }
 0x51f   :  { %v1887_v9 = vpop.f32.mrb[28].mxu1 }
 0x520   :  { %v2185_v10 = vpack.c.bf16 %v1887_v9, %v1814_v5  ;;  %v3046_v11 = vpop.f32.mrb[29].mxu1 }
 0x522   :  { %v1960_v13 = vpop.f32.mrb[42].mxu0  ;;  %3070 = vmatmul.mubr.msk.bf16.vlgmr.msra.gmra.mrb[48].mxu0 %vm902_vm2, %v2185_v10  ;;  %v2786_v10 = vld [vmem:[%s3787_s11] ss:$0 sm:$0xff] }
 0x523   :  { %v3051_v14 = vpop.f32.mrb[43].mxu0  ;;  %3080 = vmatpush3.bf16.msra.mxu0 %v2290_v12  ;;  %3081 = vmatprep.mubr.msk.bf16.mxu0 %vm3233_vm1, %v3232_v16 }
 0x524   :  { %v2033_v15 = vpop.f32.mrb[30].mxu1  ;;  %3091 = vmatprep.subr.bf16.mxu0 %v3232_v16 }
 0x525   :  { %v2283_v17 = vpack.c.bf16 %v2033_v15, %v1960_v13  ;;  %v3056_v18 = vpop.f32.mrb[31].mxu1  ;;  %v2787_v15 = vld [vmem:[%s3788_s12] ss:$0 sm:$0xff] }
 0x52a   :  { %3082 = vmatmul.mubr.msk.bf16.vlgmr.msra.gmra.mrb[52].mxu0 %vm902_vm2, %v2283_v17 }
 0x52b   :  { %3095 = vmatprep.mubr.msk.bf16.mxu0 %vm3233_vm1, %v3232_v16  ;;  %3092 = vmatpush3.bf16.msra.mxu0 %v3148_v63 }
 0x52c   :  { %3093 = vmatprep.subr.bf16.mxu0 %v3232_v16 }
 0x52f   :  { %3094 = vmatpush3.bf16.msra.mxu0 %v3149_v0 }
 0x535   :  { %v2106_v19 = vpop.f32.mrb[44].mxu0 }
 0x536   :  { %v3061_v20 = vpop.f32.mrb[45].mxu0 }
 0x537   :  { %v2179_v21 = vpop.f32.mrb[32].mxu1 }
 0x538   :  { %v2335_v22 = vpack.c.bf16 %v2179_v21, %v2106_v19  ;;  %v3066_v23 = vpop.f32.mrb[33].mxu1  ;;  %v3150_v21 = vld [vmem:[%s3791_s15] sm:$0xff]  }
 0x539   :  { %v3152_v23 = vld [vmem:[%s3791_s15 + $0x10] sm:$0xff]  }
 0x53a   :  { %3088 = vmatmul.mubr.msk.bf16.vlgmr.msra.gmra.mrb[40].mxu1 %vm902_vm2, %v2335_v22  ;;  %v3151_v22 = vld [vmem:[%s3791_s15 + $0x8] sm:$0xff]  }
 0x53b   :  { %3115 = vmatprep.mubr.msk.bf16.mxu1 %vm3233_vm1, %v3232_v16  ;;  %3100 = vmatpush3.bf16.msra.mxu1 %v3150_v21 }
 0x53c   :  { %3101 = vmatprep.subr.bf16.mxu1 %v3232_v16 }
 0x53f   :  { %3102 = vmatpush3.bf16.msra.mxu1 %v3151_v22 }
 0x540   :  { %3103 = vmatprep.subr.bf16.mxu1 %v3232_v16 }
 0x543   :  { %3104 = vmatpush3.bf16.msra.mxu1 %v3152_v23 }
 0x544   :  { %3105 = vmatprep.subr.bf16.mxu1 %v3232_v16 }
 0x5e7   :  { %v2276_v24 = vpop.f32.mrb[36].mxu1 }
 0x5e8   :  { %v3077_v25 = vpop.f32.mrb[37].mxu1 }
 0x5e9   :  { %v2279_v26 = vpop.f32.mrb[38].mxu1  ;;  %v3154_v25 = vld [vmem:[%s3791_s15 + $0x20] sm:$0xff]  }
 0x5ea   :  { %v3078_v27 = vpop.f32.mrb[39].mxu1 }
 0x5eb   :  { %v3156_v27 = vld [vmem:[%s3791_s15 + $0x30] sm:$0xff]  }
 0x5f5   :  { %v2229_v28 = vpop.f32.mrb[48].mxu0 }
 0x5f6   :  { %v2277_v29 = vadd.f32 %v2276_v24, %v2229_v28  ;;  %v3071_v30 = vpop.f32.mrb[49].mxu0  ;;  %v3153_v24 = vld [vmem:[%s3791_s15 + $0x18] sm:$0xff]  }
 0x5f7   :  { %v2232_v31 = vpop.f32.mrb[50].mxu0  ;;  %3106 = vmatpush3.bf16.msra.mxu1 %v3153_v24  ;;  %v3157_v28 = vld [vmem:[%s3791_s15 + $0x38] sm:$0xff]  }
 0x5f8   :  { %v2280_v32 = vadd.f32 %v2279_v26, %v2232_v31  ;;  %v3072_v33 = vpop.f32.mrb[51].mxu0  ;;  %3107 = vmatprep.subr.bf16.mxu1 %v3232_v16  ;;  %v3155_v26 = vld [vmem:[%s3791_s15 + $0x28] sm:$0xff]  }
 0x5fb   :  { %3108 = vmatpush3.bf16.msra.mxu1 %v3154_v25 }
 0x5fc   :  { %3109 = vmatprep.subr.bf16.mxu1 %v3232_v16 }
 0x5fd   :  { %v2326_v34 = vpop.f32.mrb[52].mxu0 }
 0x5fe   :  { %v2333_v35 = vadd.f32 %v2326_v34, %v2277_v29  ;;  %v3083_v36 = vpop.f32.mrb[53].mxu0  ;;  %v2788_v29 = vld [vmem:[%s3790_s14] ss:$0 sm:$0xff] }
 0x5ff   :  { %v2329_v2 = vpop.f32.mrb[54].mxu0  ;;  %3110 = vmatpush3.bf16.msra.mxu1 %v3155_v26 }
 0x600   :  { %v2334_v37 = vadd.f32 %v2329_v2, %v2280_v32  ;;  %v3084_v38 = vpop.f32.mrb[55].mxu0  ;;  %3111 = vmatprep.subr.bf16.mxu1 %v3232_v16 }
 0x603   :  { %3112 = vmatpush3.bf16.msra.mxu1 %v3156_v27 }
 0x604   :  { %3113 = vmatprep.subr.bf16.mxu1 %v3232_v16 }
 0x607   :  { %3114 = vmatpush3.bf16.msra.mxu1 %v3157_v28 }
 0x60d   :  { %v2378_v8 = vpop.f32.mrb[40].mxu1 }
 0x60e   :  { %v2385_v40 = vadd.f32 %v2378_v8, %v2333_v35  ;;  %v3089_v41 = vpop.f32.mrb[41].mxu1 }
 0x60f   :  { %v2381_v43 = vpop.f32.mrb[42].mxu1 }
 0x610   :  { %v2394_v44 = vadd.f32 %v2785_v39, %v2385_v40  ;;  %v2386_v45 = vadd.f32 %v2381_v43, %v2334_v37  ;;  %v3090_v46 = vpop.f32.mrb[43].mxu1 }
 0x612   :  { %v3694_v51 = vadd.f32 %v3206_v48, %v2394_v44  ;;  %v2395_v49 = vadd.f32 %v2785_v39, %v2386_v45  ;;  %v2794_v48 = vld [vmem:[%s3792_s16] ss:$0 sm:$0xff] }
 0x614   :  { %v3699_v50 = vadd.f32 %v3207_v53, %v2395_v49  ;;  %v2400_v42 = vsel %vm62_vm0, %v3694_v51, 0.0 }
 0x615   :  { %2401 = vadd.xlane.f32.xlu0 %v2400_v42 }
 0x616   :  { %v2403_v52 = vsel %vm62_vm0, %v3699_v50, 0.0 }
 0x617   :  { %2404 = vadd.xlane.f32.xlu1 %v2403_v52 }
 0x6a2   :  { %v2402_v54 = vpop.xlane.xlu0 %2401 }
 0x6a3   :  { %v2406_v47 = vmul.f32 0.03125, %v2402_v54 }
 0x6a4   :  { %v2405_v55 = vpop.xlane.xlu1 %2404 }
 0x6a5   :  { %v2408_v56 = vsub.f32 %v3694_v51, %v2406_v47  ;;  %v2407_v57 = vmul.f32 0.03125, %v2405_v55 }
 0x6a7   :  { %v2409_v58 = vsub.f32 %v3699_v50, %v2407_v57  ;;  %v2410_v59 = vmul.f32 %v2408_v56, %v2408_v56 }
 0x6a9   :  { %v2412_v60 = vsel %vm62_vm0, %v2410_v59, 0.0  ;;  %v2411_v61 = vmul.f32 %v2409_v58, %v2409_v58 }
 0x6aa   :  { %2413 = vadd.xlane.f32.xlu0 %v2412_v60 }
 0x6ab   :  { %v2415_v62 = vsel %vm62_vm0, %v2411_v61, 0.0 }
 0x6ac   :  { %2416 = vadd.xlane.f32.xlu1 %v2415_v62 }
 0x737   :  { %v2414_v1 = vpop.xlane.xlu0 %2413 }
 0x738   :  { %v2418_v3 = vmul.f32 0.03125, %v2414_v1 }
 0x739   :  { %v2417_v4 = vpop.xlane.xlu1 %2416 }
 0x73a   :  { %v2420_v5 = vadd.f32 1e-05, %v2418_v3  ;;  %v2419_v6 = vmul.f32 0.03125, %v2417_v4 }
 0x73c   :  { %3194 = vrsqrt.f32 %v2420_v5  ;;  %v2421_v7 = vadd.f32 1e-05, %v2419_v6 }
 0x73e   :  { %3196 = vrsqrt.f32 %v2421_v7 }
 0x746   :  { %v3195_v9 = vpop.eup %3194 }
 0x747   :  { %v2424_v11 = vmul.f32 %v3195_v9, %v2408_v56 }
 0x748   :  { %v3197_v12 = vpop.eup %3196 }
 0x749   :  { %v2432_v13 = vmul.f32 %v2786_v10, %v2424_v11  ;;  %v2425_v14 = vmul.f32 %v3197_v12, %v2409_v58 }
 0x74b   :  { %v2433_v17 = vmul.f32 %v2786_v10, %v2425_v14  ;;  %v2440_v18 = vadd.f32 %v2787_v15, %v2432_v13 }
 0x74d   :  { %v2441_v19 = vadd.f32 %v2787_v15, %v2433_v17 }
 0x74f   :  { %v2442_v20 = vpack.c.bf16 %v2441_v19, %v2440_v18 }
 0x751   :  { %3096 = vmatmul.mubr.msk.bf16.vlgmr.msra.gmra.mrb[56].mxu0 %vm62_vm0, %v2442_v20 }
 0x824   :  { %v2503_v30 = vpop.f32.mrb[56].mxu0 }
 0x825   :  { %v2504_v31 = vadd.f32 %v2788_v29, %v2503_v30  ;;  %v3097_v32 = vpop.f32.mrb[57].mxu0 }
 0x826   :  { %v2506_v33 = vpop.f32.mrb[58].mxu0 }
 0x827   :  { %v2792_v34 = vmul.f32 -1.702, %v2504_v31  ;;  %v2507_v35 = vadd.f32 %v2788_v29, %v2506_v33  ;;  %v3098_v36 = vpop.f32.mrb[59].mxu0 }
 0x829   :  { %v2514_v2 = vmul.f32 1.442695, %v2792_v34  ;;  %v2793_v37 = vmul.f32 -1.702, %v2507_v35 }
 0x82b   :  { %3198 = vpow2.f32 %v2514_v2  ;;  %v2516_v16 = vmul.f32 1.442695, %v2793_v37 }
 0x82d   :  { %3200 = vpow2.f32 %v2516_v16 }
 0x835   :  { %v3199_v38 = vpop.eup %3198 }
 0x836   :  { %v2518_v8 = vadd.f32 1.0, %v3199_v38 }
 0x837   :  { %v3201_v39 = vpop.eup %3200 }
 0x838   :  { %3202 = vrcp.f32 %v2518_v8  ;;  %v2519_v40 = vadd.f32 1.0, %v3201_v39 }
 0x83a   :  { %3204 = vrcp.f32 %v2519_v40 }
 0x842   :  { %v3203_v41 = vpop.eup %3202 }
 0x843   :  { %v2524_v44 = vmul.f32 %v3203_v41, %v2504_v31 }
 0x844   :  { %v3205_v43 = vpop.eup %3204 }
 0x845   :  { %v2525_v45 = vmul.f32 %v3205_v43, %v2507_v35 }
 0x847   :  { %v2526_v46 = vpack.c.bf16 %v2525_v45, %v2524_v44 }
 0x849   :  { %3116 = vmatmul.mubr.bf16.vlgmr.msra.gmra.mrb[44].mxu1 %v2526_v46 }
 0x91c   :  { %v2632_v49 = vpop.f32.mrb[44].mxu1 }
 0x91d   :  { %v2633_v53 = vadd.f32 %v2794_v48, %v2632_v49  ;;  %v3117_v42 = vpop.f32.mrb[45].mxu1 }
 0x91e   :  { %v2635_v52 = vpop.f32.mrb[46].mxu1 }
 0x91f   :  { %v2639_v54 = vadd.f32 %v2633_v53, %v3694_v51  ;;  %v2636_v47 = vadd.f32 %v2794_v48, %v2635_v52  ;;  %v3118_v55 = vpop.f32.mrb[47].mxu1 }
 0x921   :  { %2641 = vst.msk [vmem:[#allocation2] sm:$0xff] %vm62_vm0, %v2639_v54  ;;  %v2640_v56 = vadd.f32 %v2636_v47, %v3699_v50 }
 0x923   :  { %2642 = vst.msk [vmem:[#allocation2 + $0x8] sm:$0xff] %vm62_vm0, %v2640_v56 }
 0x924   :  { %3219 = shalt.err (!%p3216_p4)
}
 0x925   :  { %s3220_s1 = scalar_lea.hbm %s3793_s17, 256 }
 0x926   :  { %p3221_p5 = scmp.ne.s32.totalorder %s3793_s17, %s3220_s1  ;;  %p3224_p6 = scmp.lt.u32.totalorder %s3220_s1, %s3793_s17 }
 0x928   :  { %p3226_p7 = pnand %p3224_p6, %p3221_p5 }
 0x92a   :  { %3229 = shalt.err (!%p3226_p7)
}
 0x92b   :  { %s3235_s20 = smov 128   ;;  %s3236_s21 = smov 8  }
 0x92c   :  { %2654 = dma.vmem_to_hbm [thread:$0]  %s2649_s8, 256, %s3793_s17, [#allocation3], %s3235_s20, %s3235_s20, %s3236_s21  }
 0x92d   :  { %3230 = dma.done.wait [#allocation3], 256  }
 0x92e   :  { %3231 = vsyncadd [#allocation3], 4294967040 }
 0x92f   :  { %2658 = vsyncpa [#allocation3], 1 }

</bundles_post_ra>
